<compile_context>
chip_gen: v5e
topology: v5e:2x2
jax: 0.10.0
libtpu: 0.0.40
codegen_flags: <defaults>
</compile_context>

<pallas_src>
import functools
import math

import jax
import jax.numpy as jnp
from jax.experimental import pallas as pl
from jax.experimental.pallas import tpu as pltpu

_NEG_INF = -1e9


# --------------------------------------------------------------------------
# in-kernel helpers
# --------------------------------------------------------------------------
def _layernorm(x, gamma, beta, eps=1e-5):
    # PyTorch LayerNorm semantics: biased variance over last dim, eps in sqrt.
    mu = jnp.mean(x, axis=-1, keepdims=True)
    var = jnp.mean((x - mu) ** 2, axis=-1, keepdims=True)
    return (x - mu) * jax.lax.rsqrt(var + eps) * gamma + beta


# --------------------------------------------------------------------------
# fused encoder stack: one kernel, grid = (batch_blocks, n_layers)
# --------------------------------------------------------------------------
def _encoder_stack_kernel(label_ref, x_ref,
                          wqkv_ref, bqkv_ref, wo_ref, bo_ref,
                          g1_ref, be1_ref, w1_ref, b1_ref, w2_ref, b2_ref,
                          g2_ref, be2_ref, gf_ref, bf_ref,
                          xo_ref, attn_ref, *,
                          num_heads, n_layers, block_b,
                          apply_final_norm, compute_dtype, return_attn):
    l_idx = pl.program_id(1)
    Bt = block_b
    _, L, D = x_ref.shape
    H = num_heads
    dh = D // H
    cdt = compute_dtype
    scale = 1.0 / math.sqrt(dh)

    # additive cluster mask, rebuilt in-kernel from the (Bt, L) label rows.
    # NOTE: float equality on labels matches the PyTorch reference semantics.
    lab = label_ref[...][:, 0, :]                               # (Bt, L)
    bias = jnp.where(lab[:, :, None] == lab[:, None, :],
                     0.0, _NEG_INF).astype(jnp.float32)         # (Bt, L, L)

    # cross-layer activation carry: lives in the resident output block (same
    # block index across the layer axis -> stays in VMEM, written back to HBM
    # only when the batch block changes).
    @pl.when(l_idx == 0)
    def _():
        xo_ref[...] = x_ref[...]
    x = xo_ref[...].reshape(Bt * L, D)                          # (Bt*L, D) f32

    # fused QKV projection: one matmul, 3D-wide N fills the MXU better
    xc = x.astype(cdt)
    qkv = jnp.dot(xc, wqkv_ref[0],
                  preferred_element_type=jnp.float32) + bqkv_ref[0]
    q = (qkv[:, 0:D] * scale).astype(cdt)     # fold 1/sqrt(dh) into q once
    k = qkv[:, D:2 * D].astype(cdt)
    v = qkv[:, 2 * D:3 * D].astype(cdt)

    # per-(batch, head) attention; contexts concatenated in registers
    ctx_rows = []
    for b in range(Bt):
        r0 = b * L
        bias_b = bias[b]                                        # (L, L)
        ctx_heads = []
        for h in range(H):
            c0 = h * dh
            qh = q[r0:r0 + L, c0:c0 + dh]
            kh = k[r0:r0 + L, c0:c0 + dh]
            vh = v[r0:r0 + L, c0:c0 + dh]
            s = jnp.dot(qh, kh.T, preferred_element_type=jnp.float32) + bias_b
            s = s - jnp.max(s, axis=-1, keepdims=True)
            e = jnp.exp(s)
            denom = jnp.sum(e, axis=-1, keepdims=True)
            if return_attn:
                a = e / denom                       # exact: returned rows sum to 1
                attn_ref[b, h] = a.astype(attn_ref.dtype)
            else:
                a = e * pl.reciprocal(denom, approx=True)       # EUP slot
            ctx_heads.append(jnp.dot(a.astype(cdt), vh,
                                     preferred_element_type=jnp.float32))
        ctx_rows.append(jnp.concatenate(ctx_heads, axis=-1))    # (L, D)
    ctx = ctx_rows[0] if Bt == 1 else jnp.concatenate(ctx_rows, axis=0)

    proj = jnp.dot(ctx.astype(cdt), wo_ref[0],
                   preferred_element_type=jnp.float32) + bo_ref[0]
    x1 = _layernorm(x + proj, g1_ref[0], be1_ref[0])

    # FFN: Conv1d(D,dff,1) -> ReLU -> Conv1d(dff,D,1) == two matmuls
    hdn = jnp.maximum(
        jnp.dot(x1.astype(cdt), w1_ref[0],
                preferred_element_type=jnp.float32) + b1_ref[0], 0.0)
    ff = jnp.dot(hdn.astype(cdt), w2_ref[0],
                 preferred_element_type=jnp.float32) + b2_ref[0]
    out = _layernorm(x1 + ff, g2_ref[0], be2_ref[0])

    xo_ref[...] = out.reshape(Bt, L, D)
    if apply_final_norm:                                        # fused Encoder.norm
        @pl.when(l_idx == n_layers - 1)
        def _():
            xo_ref[...] = _layernorm(out, gf_ref[...],
                                     bf_ref[...]).reshape(Bt, L, D)


def _stack_layer_params(layer_params, compute_dtype):
    """Stack per-layer params along a leading layer dim; fuse Wq/Wk/Wv."""
    cdt = compute_dtype

    def stk(fn, dtype=None):
        a = jnp.stack([fn(p) for p in layer_params], axis=0)
        return a.astype(dtype) if dtype is not None else a

    return dict(
        wqkv=stk(lambda p: jnp.concatenate([p["wq"], p["wk"], p["wv"]], axis=1), cdt),
        bqkv=stk(lambda p: jnp.concatenate([p["bq"], p["bk"], p["bv"]], axis=1)),
        wo=stk(lambda p: p["wo"], cdt), bo=stk(lambda p: p["bo"]),
        g1=stk(lambda p: p["g1"]), be1=stk(lambda p: p["be1"]),
        w1=stk(lambda p: p["w1"], cdt), b1=stk(lambda p: p["b1"]),
        w2=stk(lambda p: p["w2"], cdt), b2=stk(lambda p: p["b2"]),
        g2=stk(lambda p: p["g2"]), be2=stk(lambda p: p["be2"]),
    )


def run_encoder_stack(x, label_arr, stacked, norm_params, *, num_heads,
                      block_b=1, compute_dtype=jnp.float32,
                      attn_dtype=jnp.float32, return_attn=True):
    B, L, D = x.shape
    Nl = stacked["wqkv"].shape[0]
    dff = stacked["w1"].shape[-1]
    H = num_heads
    assert B % block_b == 0, "block_b must divide the batch size"
    nb = B // block_b
    cdt = compute_dtype

    apply_final_norm = norm_params is not None
    if apply_final_norm:
        gf = jnp.asarray(norm_params[0], jnp.float32).reshape(1, D)
        bf = jnp.asarray(norm_params[1], jnp.float32).reshape(1, D)
    else:
        gf = jnp.ones((1, D), jnp.float32)
        bf = jnp.zeros((1, D), jnp.float32)

    label = jnp.asarray(label_arr, jnp.float32)
    args = (label, jnp.asarray(x, jnp.float32),
            stacked["wqkv"], stacked["bqkv"], stacked["wo"], stacked["bo"],
            stacked["g1"], stacked["be1"], stacked["w1"], stacked["b1"],
            stacked["w2"], stacked["b2"], stacked["g2"], stacked["be2"],
            gf, bf)

    def per_layer(shape):  # one layer's slice, streamed/double-buffered per step
        return pl.BlockSpec((1,) + shape, lambda b, l: (l,) + (0,) * len(shape))

    per_batch = lambda b, l: (b, 0, 0)
    in_specs = [
        pl.BlockSpec((block_b, 1, L), per_batch),            # labels
        pl.BlockSpec((block_b, L, D), per_batch),            # x (read at layer 0)
        per_layer((D, 3 * D)), per_layer((1, 3 * D)),        # Wqkv, bqkv
        per_layer((D, D)), per_layer((1, D)),                # Wo, bo
        per_layer((1, D)), per_layer((1, D)),                # g1, be1
        per_layer((D, dff)), per_layer((1, dff)),            # W1, b1
        per_layer((dff, D)), per_layer((1, D)),              # W2, b2
        per_layer((1, D)), per_layer((1, D)),                # g2, be2
        pl.BlockSpec((1, D), lambda b, l: (0, 0)),           # final-norm gamma
        pl.BlockSpec((1, D), lambda b, l: (0, 0)),           # final-norm beta
    ]

    x_out_spec = pl.BlockSpec((block_b, L, D), per_batch)
    if return_attn:
        # flattened (Nl*B, H, L, L) keeps the block rank at 4; reshaped after
        out_shape = (jax.ShapeDtypeStruct((B, L, D), jnp.float32),
                     jax.ShapeDtypeStruct((Nl * B, H, L, L), attn_dtype))
        out_specs = (x_out_spec,
                     pl.BlockSpec((block_b, H, L, L),
                                  lambda b, l: (l * nb + b, 0, 0, 0)))
    else:
        out_shape = jax.ShapeDtypeStruct((B, L, D), jnp.float32)
        out_specs = x_out_spec

    body = functools.partial(
        _encoder_stack_kernel, num_heads=H, n_layers=Nl, block_b=block_b,
        apply_final_norm=apply_final_norm, compute_dtype=cdt,
        return_attn=return_attn)
    kernel = body if return_attn else (lambda *refs: body(*refs, None))

    # derive vmem_limit from the per-step block footprint; cap at v7x's 64 MiB
    wbytes = jnp.dtype(cdt).itemsize
    abytes = jnp.dtype(attn_dtype).itemsize
    block_bytes = ((D * 3 * D + D * D + D * dff + dff * D) * wbytes
                   + (3 * D + D + dff + D + 6 * D) * 4
                   + block_b * L * (D + 1) * 4
                   + block_b * L * D * 4
                   + (block_b * H * L * L * abytes if return_attn else 0))
    vmem_limit = int(min(64 << 20, max(32 << 20, 4 * block_bytes + (8 << 20))))

    f = pl.pallas_call(
        kernel,
        out_shape=out_shape,
        grid=(nb, Nl),
        in_specs=in_specs,
        out_specs=out_specs,
        compiler_params=pltpu.CompilerParams(
            dimension_semantics=("parallel", "arbitrary"),
            vmem_limit_bytes=vmem_limit))
    res = f(*args)
    if return_attn:
        x_out, attn_flat = res
        return x_out, attn_flat.reshape(Nl, B, H, L, L)
    return res, None


# --------------------------------------------------------------------------
# standalone final LayerNorm (only used when the encoder has zero layers)
# --------------------------------------------------------------------------
def layernorm_kernel(x_ref, g_ref, b_ref, o_ref):
    o_ref[0] = _layernorm(x_ref[0], g_ref[...], b_ref[...])


def run_final_norm(x, gamma, beta):
    B, L, D = x.shape
    f = pl.pallas_call(
        layernorm_kernel,
        out_shape=jax.ShapeDtypeStruct((B, L, D), jnp.float32),
        grid=(B,),
        in_specs=[pl.BlockSpec((1, L, D), lambda b: (b, 0, 0)),
                  pl.BlockSpec((1, D), lambda b: (0, 0)),
                  pl.BlockSpec((1, D), lambda b: (0, 0))],
        out_specs=pl.BlockSpec((1, L, D), lambda b: (b, 0, 0)),
        compiler_params=pltpu.CompilerParams(dimension_semantics=("parallel",)))
    return f(jnp.asarray(x, jnp.float32),
             jnp.asarray(gamma, jnp.float32).reshape(1, D),
             jnp.asarray(beta, jnp.float32).reshape(1, D))


# --------------------------------------------------------------------------
# Encoder wrapper (mirrors the PyTorch module's forward)
# --------------------------------------------------------------------------
class Encoder:
    def __init__(self, layer_params, norm_params=None, num_heads=4,
                 compute_dtype=jnp.float32, attn_dtype=jnp.float32,
                 return_attn=True, block_b=1):
        self.layer_params = list(layer_params)
        self.norm_params = norm_params
        self.num_heads = num_heads
        self.compute_dtype = compute_dtype
        self.attn_dtype = attn_dtype
        self.return_attn = return_attn      # when False, attention_list holds None
        self.block_b = block_b              # batch elements per grid step
        self.stacked = (_stack_layer_params(self.layer_params, compute_dtype)
                        if self.layer_params else None)

    def forward(self, x, label_arr):
        x = jnp.asarray(x, jnp.float32)
        n = len(self.layer_params)
        if n == 0:
            if self.norm_params is not None:
                x = run_final_norm(x, *self.norm_params)
            return x, []
        x_out, attn = run_encoder_stack(
            x, label_arr, self.stacked, self.norm_params,
            num_heads=self.num_heads, block_b=self.block_b,
            compute_dtype=self.compute_dtype, attn_dtype=self.attn_dtype,
            return_attn=self.return_attn)
        if attn is None:
            attention_list = [None] * n
        else:
            attention_list = [attn[i] for i in range(n)]
        return x_out, attention_list


# --------------------------------------------------------------------------
# pure-JAX reference (sanity check)
# --------------------------------------------------------------------------
def _ref_layer(x, label, p, H):
    B, L, D = x.shape
    dh = D // H
    same = (label[:, 0, :, None] == label[:, 0, None, :])             # (B,L,L)
    q = x @ p["wq"] + p["bq"]
    k = x @ p["wk"] + p["bk"]
    v = x @ p["wv"] + p["bv"]
    q = q.reshape(B, L, H, dh).transpose(0, 2, 1, 3)
    k = k.reshape(B, L, H, dh).transpose(0, 2, 1, 3)
    v = v.reshape(B, L, H, dh).transpose(0, 2, 1, 3)
    s = jnp.einsum("bhqd,bhkd->bhqk", q, k) / math.sqrt(dh)
    s = jnp.where(same[:, None], s, -1e9)
    a = jax.nn.softmax(s, axis=-1)
    ctx = jnp.einsum("bhqk,bhkd->bhqd", a, v).transpose(0, 2, 1, 3).reshape(B, L, D)
    ctx = ctx @ p["wo"] + p["bo"]

    def ln(y, g, b):
        mu = y.mean(-1, keepdims=True)
        var = ((y - mu) ** 2).mean(-1, keepdims=True)
        return (y - mu) / jnp.sqrt(var + 1e-5) * g + b

    x1 = ln(x + ctx, p["g1"], p["be1"])
    ff = jnp.maximum(x1 @ p["w1"] + p["b1"], 0.0) @ p["w2"] + p["b2"]
    return ln(x1 + ff, p["g2"], p["be2"]), a


# --------------------------------------------------------------------------
def make_layer_params(key, D, dff):
    ks = jax.random.split(key, 6)
    z = lambda n: jnp.zeros((1, n), jnp.float32)
    o = lambda n: jnp.ones((1, n), jnp.float32)
    s = 0.05
    return dict(
        wq=s * jax.random.normal(ks[0], (D, D), jnp.float32), bq=z(D),
        wk=s * jax.random.normal(ks[1], (D, D), jnp.float32), bk=z(D),
        wv=s * jax.random.normal(ks[2], (D, D), jnp.float32), bv=z(D),
        wo=s * jax.random.normal(ks[3], (D, D), jnp.float32), bo=z(D),
        g1=o(D), be1=z(D),
        w1=s * jax.random.normal(ks[4], (D, dff), jnp.float32), b1=z(dff),
        w2=s * jax.random.normal(ks[5], (dff, D), jnp.float32), b2=z(D),
        g2=o(D), be2=z(D),
    )


if __name__ == "__main__":
    B, L, D, H, DFF, NLAYERS = 2, 8, 32, 4, 64, 2

    root = jax.random.PRNGKey(0)
    kx, klab, *kl = jax.random.split(root, 2 + NLAYERS)

    x = jax.random.normal(kx, (B, L, D), jnp.float32)
    label_arr = jax.random.randint(klab, (B, 1, L), 0, 2).astype(jnp.float32)

    layer_params = [make_layer_params(k, D, DFF) for k in kl]
    norm_params = (jnp.ones((1, D), jnp.float32), jnp.zeros((1, D), jnp.float32))

    # pure-JAX reference
    xr = x
    attn0_ref = None
    for i, p in enumerate(layer_params):
        xr, a_ref = _ref_layer(xr, label_arr, p, H)
        if i == 0:
            attn0_ref = a_ref
    mu = xr.mean(-1, keepdims=True)
    var = ((xr - mu) ** 2).mean(-1, keepdims=True)
    xr = (xr - mu) / jnp.sqrt(var + 1e-5) * norm_params[0] + norm_params[1]

    # ---- f32 path, attention maps returned, one batch element per grid step ----
    enc = Encoder(layer_params, norm_params, num_heads=H)
    out, attn_list = enc.forward(x, label_arr)
    out = jax.block_until_ready(out)
    attn_list = [jax.block_until_ready(a) for a in attn_list]

    assert out.shape == (B, L, D)
    assert len(attn_list) == NLAYERS and attn_list[0].shape == (B, H, L, L)
    assert jnp.allclose(out, xr, atol=2e-3, rtol=2e-3)
    assert jnp.allclose(attn_list[0], attn0_ref, atol=2e-3, rtol=2e-3)

    # ---- f32 path, both batch elements processed in one grid step ----
    enc_b2 = Encoder(layer_params, norm_params, num_heads=H, block_b=2)
    out_b2, _ = enc_b2.forward(x, label_arr)
    out_b2 = jax.block_until_ready(out_b2)
    assert jnp.allclose(out_b2, xr, atol=2e-3, rtol=2e-3)

    # ---- perf config: bf16 matmul operands, attention maps disabled ----
    enc_fast = Encoder(layer_params, norm_params, num_heads=H,
                       compute_dtype=jnp.bfloat16, return_attn=False, block_b=2)
    out_fast, attn_fast = enc_fast.forward(x, label_arr)
    out_fast = jax.block_until_ready(out_fast)
    assert out_fast.shape == (B, L, D)
    assert all(a is None for a in attn_fast)
    assert bool(jnp.all(jnp.isfinite(out_fast)))
    assert float(jnp.max(jnp.abs(out_fast - xr))) < 0.2   # bf16 operand tolerance

    print("KERNEL_OK")
</pallas_src>

<mosaic_0001>
module attributes {stable_mosaic.version = 11 : i64} {
  func.func @_encoder_stack_kernel(%arg0: i32, %arg1: i32, %arg2: memref<1x1x8xf32, #tpu.memory_space<vmem>>, %arg3: memref<1x8x32xf32, #tpu.memory_space<vmem>>, %arg4: memref<1x32x96xf32, #tpu.memory_space<vmem>>, %arg5: memref<1x1x96xf32, #tpu.memory_space<vmem>>, %arg6: memref<1x32x32xf32, #tpu.memory_space<vmem>>, %arg7: memref<1x1x32xf32, #tpu.memory_space<vmem>>, %arg8: memref<1x1x32xf32, #tpu.memory_space<vmem>>, %arg9: memref<1x1x32xf32, #tpu.memory_space<vmem>>, %arg10: memref<1x32x64xf32, #tpu.memory_space<vmem>>, %arg11: memref<1x1x64xf32, #tpu.memory_space<vmem>>, %arg12: memref<1x64x32xf32, #tpu.memory_space<vmem>>, %arg13: memref<1x1x32xf32, #tpu.memory_space<vmem>>, %arg14: memref<1x1x32xf32, #tpu.memory_space<vmem>>, %arg15: memref<1x1x32xf32, #tpu.memory_space<vmem>>, %arg16: memref<1x32xf32, #tpu.memory_space<vmem>>, %arg17: memref<1x32xf32, #tpu.memory_space<vmem>>, %arg18: memref<1x8x32xf32, #tpu.memory_space<vmem>>, %arg19: memref<1x4x8x8xf32, #tpu.memory_space<vmem>>) attributes {dimension_semantics = [#tpu.dimension_semantics<parallel>, #tpu.dimension_semantics<arbitrary>], iteration_bounds = array<i64: 2, 2>, scalar_prefetch = 0 : i64, scratch_operands = 0 : i64, tpu.core_type = #tpu.core_type<tc>, window_params = [{transform_indices = @transform_0, window_bounds = array<i64: 1, 1, 8>}, {transform_indices = @transform_1, window_bounds = array<i64: 1, 8, 32>}, {transform_indices = @transform_2, window_bounds = array<i64: 1, 32, 96>}, {transform_indices = @transform_3, window_bounds = array<i64: 1, 1, 96>}, {transform_indices = @transform_4, window_bounds = array<i64: 1, 32, 32>}, {transform_indices = @transform_5, window_bounds = array<i64: 1, 1, 32>}, {transform_indices = @transform_6, window_bounds = array<i64: 1, 1, 32>}, {transform_indices = @transform_7, window_bounds = array<i64: 1, 1, 32>}, {transform_indices = @transform_8, window_bounds = array<i64: 1, 32, 64>}, {transform_indices = @transform_9, window_bounds = array<i64: 1, 1, 64>}, {transform_indices = @transform_10, window_bounds = array<i64: 1, 64, 32>}, {transform_indices = @transform_11, window_bounds = array<i64: 1, 1, 32>}, {transform_indices = @transform_12, window_bounds = array<i64: 1, 1, 32>}, {transform_indices = @transform_13, window_bounds = array<i64: 1, 1, 32>}, {pipeline_mode = #tpu.pipeline_mode<synchronous>, transform_indices = @transform_14, window_bounds = array<i64: 1, 32>}, {pipeline_mode = #tpu.pipeline_mode<synchronous>, transform_indices = @transform_15, window_bounds = array<i64: 1, 32>}, {transform_indices = @transform_16, window_bounds = array<i64: 1, 8, 32>}, {transform_indices = @transform_17, window_bounds = array<i64: 1, 4, 8, 8>}]} {
    %c0 = arith.constant 0 : index
    %c0_0 = arith.constant 0 : index
    %c0_1 = arith.constant 0 : index
    %0 = vector.load %arg2[%c0, %c0_0, %c0_1] : memref<1x1x8xf32, #tpu.memory_space<vmem>>, vector<1x1x8xf32>
    %1 = vector.shape_cast %0 : vector<1x1x8xf32> to vector<1x8xf32>
    %2 = vector.shape_cast %1 : vector<1x8xf32> to vector<1x8x1xf32>
    %3 = vector.shape_cast %1 : vector<1x8xf32> to vector<1x1x8xf32>
    %4 = vector.broadcast %2 : vector<1x8x1xf32> to vector<1x8x8xf32>
    %5 = vector.broadcast %3 : vector<1x1x8xf32> to vector<1x8x8xf32>
    %6 = arith.cmpf oeq, %4, %5 : vector<1x8x8xf32>
    %cst = arith.constant 0.000000e+00 : f32
    %cst_2 = arith.constant -1.000000e+09 : f32
    %7 = vector.broadcast %cst : f32 to vector<1x8x8xf32>
    %8 = vector.broadcast %cst_2 : f32 to vector<1x8x8xf32>
    %9 = arith.select %6, %7, %8 : vector<1x8x8xi1>, vector<1x8x8xf32>
    %c0_i32 = arith.constant 0 : i32
    %10 = arith.cmpi eq, %arg1, %c0_i32 : i32
    %11 = arith.extui %10 : i1 to i32
    %c0_i32_3 = arith.constant 0 : i32
    %12 = arith.cmpi ne, %11, %c0_i32_3 : i32
    scf.if %12 {
      %c0_92 = arith.constant 0 : index
      %c0_93 = arith.constant 0 : index
      %c0_94 = arith.constant 0 : index
      %187 = vector.load %arg3[%c0_92, %c0_93, %c0_94] : memref<1x8x32xf32, #tpu.memory_space<vmem>>, vector<1x8x32xf32>
      %c0_95 = arith.constant 0 : index
      %c0_96 = arith.constant 0 : index
      %c0_97 = arith.constant 0 : index
      %188 = vector.load %arg18[%c0_95, %c0_96, %c0_97] : memref<1x8x32xf32, #tpu.memory_space<vmem>>, vector<1x8x32xf32>
      tpu.vector_store %arg18[%c0_95, %c0_96, %c0_97], %187 {strides = array<i32>} : memref<1x8x32xf32, #tpu.memory_space<vmem>>, vector<1x8x32xf32>,
    } else {
    }
    %c0_4 = arith.constant 0 : index
    %c0_5 = arith.constant 0 : index
    %c0_6 = arith.constant 0 : index
    %13 = vector.load %arg18[%c0_4, %c0_5, %c0_6] : memref<1x8x32xf32, #tpu.memory_space<vmem>>, vector<1x8x32xf32>
    %14 = vector.shape_cast %13 : vector<1x8x32xf32> to vector<8x32xf32>
    %c0_7 = arith.constant 0 : index
    %c0_8 = arith.constant 0 : index
    %c0_9 = arith.constant 0 : index
    %15 = vector.load %arg4[%c0_7, %c0_8, %c0_9] : memref<1x32x96xf32, #tpu.memory_space<vmem>>, vector<1x32x96xf32>
    %16 = vector.shape_cast %15 : vector<1x32x96xf32> to vector<32x96xf32>
    %cst_10 = arith.constant dense<0.000000e+00> : vector<8x96xf32>
    %17 = tpu.matmul %14, %16, %cst_10 {dimension_numbers = #tpu.dot_dimension_numbers<[1], [0], [0], [1], [0, 0, 1, 1], [], []>} : vector<8x32xf32>, vector<32x96xf32>, vector<8x96xf32> -> vector<8x96xf32>
    %c0_11 = arith.constant 0 : index
    %c0_12 = arith.constant 0 : index
    %c0_13 = arith.constant 0 : index
    %18 = vector.load %arg5[%c0_11, %c0_12, %c0_13] : memref<1x1x96xf32, #tpu.memory_space<vmem>>, vector<1x1x96xf32>
    %19 = vector.shape_cast %18 : vector<1x1x96xf32> to vector<1x96xf32>
    %20 = vector.broadcast %19 : vector<1x96xf32> to vector<8x96xf32>
    %21 = arith.addf %17, %20 : vector<8x96xf32>
    %22 = vector.extract_strided_slice %21 {offsets = [0, 0], sizes = [8, 32], strides = [1, 1]} : vector<8x96xf32> to vector<8x32xf32>
    %cst_14 = arith.constant 0.353553385 : f32
    %23 = vector.broadcast %cst_14 : f32 to vector<8x32xf32>
    %24 = arith.mulf %22, %23 : vector<8x32xf32>
    %25 = vector.extract_strided_slice %21 {offsets = [0, 32], sizes = [8, 32], strides = [1, 1]} : vector<8x96xf32> to vector<8x32xf32>
    %26 = vector.extract_strided_slice %21 {offsets = [0, 64], sizes = [8, 32], strides = [1, 1]} : vector<8x96xf32> to vector<8x32xf32>
    %27 = vector.shape_cast %9 : vector<1x8x8xf32> to vector<8x8xf32>
    %28 = vector.extract_strided_slice %24 {offsets = [0, 0], sizes = [8, 8], strides = [1, 1]} : vector<8x32xf32> to vector<8x8xf32>
    %29 = vector.extract_strided_slice %25 {offsets = [0, 0], sizes = [8, 8], strides = [1, 1]} : vector<8x32xf32> to vector<8x8xf32>
    %30 = vector.extract_strided_slice %26 {offsets = [0, 0], sizes = [8, 8], strides = [1, 1]} : vector<8x32xf32> to vector<8x8xf32>
    %31 = tpu.transpose %29, [1, 0] : vector<8x8xf32> -> vector<8x8xf32>
    %cst_15 = arith.constant dense<0.000000e+00> : vector<8x8xf32>
    %32 = tpu.matmul %28, %31, %cst_15 {dimension_numbers = #tpu.dot_dimension_numbers<[1], [0], [0], [1], [0, 0, 1, 1], [], []>} : vector<8x8xf32>, vector<8x8xf32>, vector<8x8xf32> -> vector<8x8xf32>
    %33 = arith.addf %32, %27 : vector<8x8xf32>
    %cst_16 = arith.constant dense<0xFF800000> : vector<8xf32>
    %34 = vector.multi_reduction <maximumf>, %33, %cst_16 [1] : vector<8x8xf32> to vector<8xf32>
    %35 = vector.shape_cast %34 : vector<8xf32> to vector<8x1xf32>
    %36 = vector.broadcast %35 : vector<8x1xf32> to vector<8x8xf32>
    %37 = arith.subf %33, %36 : vector<8x8xf32>
    %38 = math.exp %37 : vector<8x8xf32>
    %cst_17 = arith.constant dense<0.000000e+00> : vector<8xf32>
    %39 = vector.multi_reduction <add>, %38, %cst_17 [1] : vector<8x8xf32> to vector<8xf32>
    %40 = vector.shape_cast %39 : vector<8xf32> to vector<8x1xf32>
    %41 = vector.broadcast %40 : vector<8x1xf32> to vector<8x8xf32>
    %42 = arith.divf %38, %41 : vector<8x8xf32>
    %c0_18 = arith.constant 0 : index
    %c0_19 = arith.constant 0 : index
    %c0_20 = arith.constant 0 : index
    %c0_21 = arith.constant 0 : index
    %43 = vector.load %arg19[%c0_18, %c0_19, %c0_20, %c0_21] : memref<1x4x8x8xf32, #tpu.memory_space<vmem>>, vector<1x1x8x8xf32>
    %44 = vector.shape_cast %43 : vector<1x1x8x8xf32> to vector<8x8xf32>
    %45 = vector.shape_cast %42 : vector<8x8xf32> to vector<1x1x8x8xf32>
    tpu.vector_store %arg19[%c0_18, %c0_19, %c0_20, %c0_21], %45 {strides = array<i32>} : memref<1x4x8x8xf32, #tpu.memory_space<vmem>>, vector<1x1x8x8xf32>,
    %cst_22 = arith.constant dense<0.000000e+00> : vector<8x8xf32>
    %46 = tpu.matmul %42, %30, %cst_22 {dimension_numbers = #tpu.dot_dimension_numbers<[1], [0], [0], [1], [0, 0, 1, 1], [], []>} : vector<8x8xf32>, vector<8x8xf32>, vector<8x8xf32> -> vector<8x8xf32>
    %47 = vector.extract_strided_slice %24 {offsets = [0, 8], sizes = [8, 8], strides = [1, 1]} : vector<8x32xf32> to vector<8x8xf32>
    %48 = vector.extract_strided_slice %25 {offsets = [0, 8], sizes = [8, 8], strides = [1, 1]} : vector<8x32xf32> to vector<8x8xf32>
    %49 = vector.extract_strided_slice %26 {offsets = [0, 8], sizes = [8, 8], strides = [1, 1]} : vector<8x32xf32> to vector<8x8xf32>
    %50 = tpu.transpose %48, [1, 0] : vector<8x8xf32> -> vector<8x8xf32>
    %cst_23 = arith.constant dense<0.000000e+00> : vector<8x8xf32>
    %51 = tpu.matmul %47, %50, %cst_23 {dimension_numbers = #tpu.dot_dimension_numbers<[1], [0], [0], [1], [0, 0, 1, 1], [], []>} : vector<8x8xf32>, vector<8x8xf32>, vector<8x8xf32> -> vector<8x8xf32>
    %52 = arith.addf %51, %27 : vector<8x8xf32>
    %cst_24 = arith.constant dense<0xFF800000> : vector<8xf32>
    %53 = vector.multi_reduction <maximumf>, %52, %cst_24 [1] : vector<8x8xf32> to vector<8xf32>
    %54 = vector.shape_cast %53 : vector<8xf32> to vector<8x1xf32>
    %55 = vector.broadcast %54 : vector<8x1xf32> to vector<8x8xf32>
    %56 = arith.subf %52, %55 : vector<8x8xf32>
    %57 = math.exp %56 : vector<8x8xf32>
    %cst_25 = arith.constant dense<0.000000e+00> : vector<8xf32>
    %58 = vector.multi_reduction <add>, %57, %cst_25 [1] : vector<8x8xf32> to vector<8xf32>
    %59 = vector.shape_cast %58 : vector<8xf32> to vector<8x1xf32>
    %60 = vector.broadcast %59 : vector<8x1xf32> to vector<8x8xf32>
    %61 = arith.divf %57, %60 : vector<8x8xf32>
    %c0_26 = arith.constant 0 : index
    %c1 = arith.constant 1 : index
    %c0_27 = arith.constant 0 : index
    %c0_28 = arith.constant 0 : index
    %62 = vector.load %arg19[%c0_26, %c1, %c0_27, %c0_28] : memref<1x4x8x8xf32, #tpu.memory_space<vmem>>, vector<1x1x8x8xf32>
    %63 = vector.shape_cast %62 : vector<1x1x8x8xf32> to vector<8x8xf32>
    %64 = vector.shape_cast %61 : vector<8x8xf32> to vector<1x1x8x8xf32>
    tpu.vector_store %arg19[%c0_26, %c1, %c0_27, %c0_28], %64 {strides = array<i32>} : memref<1x4x8x8xf32, #tpu.memory_space<vmem>>, vector<1x1x8x8xf32>,
    %cst_29 = arith.constant dense<0.000000e+00> : vector<8x8xf32>
    %65 = tpu.matmul %61, %49, %cst_29 {dimension_numbers = #tpu.dot_dimension_numbers<[1], [0], [0], [1], [0, 0, 1, 1], [], []>} : vector<8x8xf32>, vector<8x8xf32>, vector<8x8xf32> -> vector<8x8xf32>
    %66 = vector.extract_strided_slice %24 {offsets = [0, 16], sizes = [8, 8], strides = [1, 1]} : vector<8x32xf32> to vector<8x8xf32>
    %67 = vector.extract_strided_slice %25 {offsets = [0, 16], sizes = [8, 8], strides = [1, 1]} : vector<8x32xf32> to vector<8x8xf32>
    %68 = vector.extract_strided_slice %26 {offsets = [0, 16], sizes = [8, 8], strides = [1, 1]} : vector<8x32xf32> to vector<8x8xf32>
    %69 = tpu.transpose %67, [1, 0] : vector<8x8xf32> -> vector<8x8xf32>
    %cst_30 = arith.constant dense<0.000000e+00> : vector<8x8xf32>
    %70 = tpu.matmul %66, %69, %cst_30 {dimension_numbers = #tpu.dot_dimension_numbers<[1], [0], [0], [1], [0, 0, 1, 1], [], []>} : vector<8x8xf32>, vector<8x8xf32>, vector<8x8xf32> -> vector<8x8xf32>
    %71 = arith.addf %70, %27 : vector<8x8xf32>
    %cst_31 = arith.constant dense<0xFF800000> : vector<8xf32>
    %72 = vector.multi_reduction <maximumf>, %71, %cst_31 [1] : vector<8x8xf32> to vector<8xf32>
    %73 = vector.shape_cast %72 : vector<8xf32> to vector<8x1xf32>
    %74 = vector.broadcast %73 : vector<8x1xf32> to vector<8x8xf32>
    %75 = arith.subf %71, %74 : vector<8x8xf32>
    %76 = math.exp %75 : vector<8x8xf32>
    %cst_32 = arith.constant dense<0.000000e+00> : vector<8xf32>
    %77 = vector.multi_reduction <add>, %76, %cst_32 [1] : vector<8x8xf32> to vector<8xf32>
    %78 = vector.shape_cast %77 : vector<8xf32> to vector<8x1xf32>
    %79 = vector.broadcast %78 : vector<8x1xf32> to vector<8x8xf32>
    %80 = arith.divf %76, %79 : vector<8x8xf32>
    %c0_33 = arith.constant 0 : index
    %c2 = arith.constant 2 : index
    %c0_34 = arith.constant 0 : index
    %c0_35 = arith.constant 0 : index
    %81 = vector.load %arg19[%c0_33, %c2, %c0_34, %c0_35] : memref<1x4x8x8xf32, #tpu.memory_space<vmem>>, vector<1x1x8x8xf32>
    %82 = vector.shape_cast %81 : vector<1x1x8x8xf32> to vector<8x8xf32>
    %83 = vector.shape_cast %80 : vector<8x8xf32> to vector<1x1x8x8xf32>
    tpu.vector_store %arg19[%c0_33, %c2, %c0_34, %c0_35], %83 {strides = array<i32>} : memref<1x4x8x8xf32, #tpu.memory_space<vmem>>, vector<1x1x8x8xf32>,
    %cst_36 = arith.constant dense<0.000000e+00> : vector<8x8xf32>
    %84 = tpu.matmul %80, %68, %cst_36 {dimension_numbers = #tpu.dot_dimension_numbers<[1], [0], [0], [1], [0, 0, 1, 1], [], []>} : vector<8x8xf32>, vector<8x8xf32>, vector<8x8xf32> -> vector<8x8xf32>
    %85 = vector.extract_strided_slice %24 {offsets = [0, 24], sizes = [8, 8], strides = [1, 1]} : vector<8x32xf32> to vector<8x8xf32>
    %86 = vector.extract_strided_slice %25 {offsets = [0, 24], sizes = [8, 8], strides = [1, 1]} : vector<8x32xf32> to vector<8x8xf32>
    %87 = vector.extract_strided_slice %26 {offsets = [0, 24], sizes = [8, 8], strides = [1, 1]} : vector<8x32xf32> to vector<8x8xf32>
    %88 = tpu.transpose %86, [1, 0] : vector<8x8xf32> -> vector<8x8xf32>
    %cst_37 = arith.constant dense<0.000000e+00> : vector<8x8xf32>
    %89 = tpu.matmul %85, %88, %cst_37 {dimension_numbers = #tpu.dot_dimension_numbers<[1], [0], [0], [1], [0, 0, 1, 1], [], []>} : vector<8x8xf32>, vector<8x8xf32>, vector<8x8xf32> -> vector<8x8xf32>
    %90 = arith.addf %89, %27 : vector<8x8xf32>
    %cst_38 = arith.constant dense<0xFF800000> : vector<8xf32>
    %91 = vector.multi_reduction <maximumf>, %90, %cst_38 [1] : vector<8x8xf32> to vector<8xf32>
    %92 = vector.shape_cast %91 : vector<8xf32> to vector<8x1xf32>
    %93 = vector.broadcast %92 : vector<8x1xf32> to vector<8x8xf32>
    %94 = arith.subf %90, %93 : vector<8x8xf32>
    %95 = math.exp %94 : vector<8x8xf32>
    %cst_39 = arith.constant dense<0.000000e+00> : vector<8xf32>
    %96 = vector.multi_reduction <add>, %95, %cst_39 [1] : vector<8x8xf32> to vector<8xf32>
    %97 = vector.shape_cast %96 : vector<8xf32> to vector<8x1xf32>
    %98 = vector.broadcast %97 : vector<8x1xf32> to vector<8x8xf32>
    %99 = arith.divf %95, %98 : vector<8x8xf32>
    %c0_40 = arith.constant 0 : index
    %c3 = arith.constant 3 : index
    %c0_41 = arith.constant 0 : index
    %c0_42 = arith.constant 0 : index
    %100 = vector.load %arg19[%c0_40, %c3, %c0_41, %c0_42] : memref<1x4x8x8xf32, #tpu.memory_space<vmem>>, vector<1x1x8x8xf32>
    %101 = vector.shape_cast %100 : vector<1x1x8x8xf32> to vector<8x8xf32>
    %102 = vector.shape_cast %99 : vector<8x8xf32> to vector<1x1x8x8xf32>
    tpu.vector_store %arg19[%c0_40, %c3, %c0_41, %c0_42], %102 {strides = array<i32>} : memref<1x4x8x8xf32, #tpu.memory_space<vmem>>, vector<1x1x8x8xf32>,
    %cst_43 = arith.constant dense<0.000000e+00> : vector<8x8xf32>
    %103 = tpu.matmul %99, %87, %cst_43 {dimension_numbers = #tpu.dot_dimension_numbers<[1], [0], [0], [1], [0, 0, 1, 1], [], []>} : vector<8x8xf32>, vector<8x8xf32>, vector<8x8xf32> -> vector<8x8xf32>
    %104 = tpu.concatenate %46, %65, %84, %103 in 1 : vector<8x8xf32>, vector<8x8xf32>, vector<8x8xf32>, vector<8x8xf32> -> vector<8x32xf32>
    %c0_44 = arith.constant 0 : index
    %c0_45 = arith.constant 0 : index
    %c0_46 = arith.constant 0 : index
    %105 = vector.load %arg6[%c0_44, %c0_45, %c0_46] : memref<1x32x32xf32, #tpu.memory_space<vmem>>, vector<1x32x32xf32>
    %106 = vector.shape_cast %105 : vector<1x32x32xf32> to vector<32x32xf32>
    %cst_47 = arith.constant dense<0.000000e+00> : vector<8x32xf32>
    %107 = tpu.matmul %104, %106, %cst_47 {dimension_numbers = #tpu.dot_dimension_numbers<[1], [0], [0], [1], [0, 0, 1, 1], [], []>} : vector<8x32xf32>, vector<32x32xf32>, vector<8x32xf32> -> vector<8x32xf32>
    %c0_48 = arith.constant 0 : index
    %c0_49 = arith.constant 0 : index
    %c0_50 = arith.constant 0 : index
    %108 = vector.load %arg7[%c0_48, %c0_49, %c0_50] : memref<1x1x32xf32, #tpu.memory_space<vmem>>, vector<1x1x32xf32>
    %109 = vector.shape_cast %108 : vector<1x1x32xf32> to vector<1x32xf32>
    %110 = vector.broadcast %109 : vector<1x32xf32> to vector<8x32xf32>
    %111 = arith.addf %107, %110 : vector<8x32xf32>
    %112 = arith.addf %14, %111 : vector<8x32xf32>
    %c0_51 = arith.constant 0 : index
    %c0_52 = arith.constant 0 : index
    %c0_53 = arith.constant 0 : index
    %113 = vector.load %arg8[%c0_51, %c0_52, %c0_53] : memref<1x1x32xf32, #tpu.memory_space<vmem>>, vector<1x1x32xf32>
    %114 = vector.shape_cast %113 : vector<1x1x32xf32> to vector<1x32xf32>
    %c0_54 = arith.constant 0 : index
    %c0_55 = arith.constant 0 : index
    %c0_56 = arith.constant 0 : index
    %115 = vector.load %arg9[%c0_54, %c0_55, %c0_56] : memref<1x1x32xf32, #tpu.memory_space<vmem>>, vector<1x1x32xf32>
    %116 = vector.shape_cast %115 : vector<1x1x32xf32> to vector<1x32xf32>
    %cst_57 = arith.constant dense<0.000000e+00> : vector<8xf32>
    %117 = vector.multi_reduction <add>, %112, %cst_57 [1] : vector<8x32xf32> to vector<8xf32>
    %118 = vector.shape_cast %117 : vector<8xf32> to vector<8x1xf32>
    %cst_58 = arith.constant 3.200000e+01 : f32
    %119 = vector.broadcast %cst_58 : f32 to vector<8x1xf32>
    %120 = arith.divf %118, %119 : vector<8x1xf32>
    %121 = vector.broadcast %120 : vector<8x1xf32> to vector<8x32xf32>
    %122 = arith.subf %112, %121 : vector<8x32xf32>
    %123 = arith.mulf %122, %122 : vector<8x32xf32>
    %cst_59 = arith.constant dense<0.000000e+00> : vector<8xf32>
    %124 = vector.multi_reduction <add>, %123, %cst_59 [1] : vector<8x32xf32> to vector<8xf32>
    %125 = vector.shape_cast %124 : vector<8xf32> to vector<8x1xf32>
    %cst_60 = arith.constant 3.200000e+01 : f32
    %126 = vector.broadcast %cst_60 : f32 to vector<8x1xf32>
    %127 = arith.divf %125, %126 : vector<8x1xf32>
    %128 = vector.broadcast %120 : vector<8x1xf32> to vector<8x32xf32>
    %129 = arith.subf %112, %128 : vector<8x32xf32>
    %cst_61 = arith.constant 9.99999974E-6 : f32
    %130 = vector.broadcast %cst_61 : f32 to vector<8x1xf32>
    %131 = arith.addf %127, %130 : vector<8x1xf32>
    %132 = math.rsqrt %131 : vector<8x1xf32>
    %133 = vector.broadcast %132 : vector<8x1xf32> to vector<8x32xf32>
    %134 = arith.mulf %129, %133 : vector<8x32xf32>
    %135 = vector.broadcast %114 : vector<1x32xf32> to vector<8x32xf32>
    %136 = arith.mulf %134, %135 : vector<8x32xf32>
    %137 = vector.broadcast %116 : vector<1x32xf32> to vector<8x32xf32>
    %138 = arith.addf %136, %137 : vector<8x32xf32>
    %c0_62 = arith.constant 0 : index
    %c0_63 = arith.constant 0 : index
    %c0_64 = arith.constant 0 : index
    %139 = vector.load %arg10[%c0_62, %c0_63, %c0_64] : memref<1x32x64xf32, #tpu.memory_space<vmem>>, vector<1x32x64xf32>
    %140 = vector.shape_cast %139 : vector<1x32x64xf32> to vector<32x64xf32>
    %cst_65 = arith.constant dense<0.000000e+00> : vector<8x64xf32>
    %141 = tpu.matmul %138, %140, %cst_65 {dimension_numbers = #tpu.dot_dimension_numbers<[1], [0], [0], [1], [0, 0, 1, 1], [], []>} : vector<8x32xf32>, vector<32x64xf32>, vector<8x64xf32> -> vector<8x64xf32>
    %c0_66 = arith.constant 0 : index
    %c0_67 = arith.constant 0 : index
    %c0_68 = arith.constant 0 : index
    %142 = vector.load %arg11[%c0_66, %c0_67, %c0_68] : memref<1x1x64xf32, #tpu.memory_space<vmem>>, vector<1x1x64xf32>
    %143 = vector.shape_cast %142 : vector<1x1x64xf32> to vector<1x64xf32>
    %144 = vector.broadcast %143 : vector<1x64xf32> to vector<8x64xf32>
    %145 = arith.addf %141, %144 : vector<8x64xf32>
    %cst_69 = arith.constant 0.000000e+00 : f32
    %146 = vector.broadcast %cst_69 : f32 to vector<8x64xf32>
    %147 = arith.maximumf %145, %146 : vector<8x64xf32>
    %c0_70 = arith.constant 0 : index
    %c0_71 = arith.constant 0 : index
    %c0_72 = arith.constant 0 : index
    %148 = vector.load %arg12[%c0_70, %c0_71, %c0_72] : memref<1x64x32xf32, #tpu.memory_space<vmem>>, vector<1x64x32xf32>
    %149 = vector.shape_cast %148 : vector<1x64x32xf32> to vector<64x32xf32>
    %cst_73 = arith.constant dense<0.000000e+00> : vector<8x32xf32>
    %150 = tpu.matmul %147, %149, %cst_73 {dimension_numbers = #tpu.dot_dimension_numbers<[1], [0], [0], [1], [0, 0, 1, 1], [], []>} : vector<8x64xf32>, vector<64x32xf32>, vector<8x32xf32> -> vector<8x32xf32>
    %c0_74 = arith.constant 0 : index
    %c0_75 = arith.constant 0 : index
    %c0_76 = arith.constant 0 : index
    %151 = vector.load %arg13[%c0_74, %c0_75, %c0_76] : memref<1x1x32xf32, #tpu.memory_space<vmem>>, vector<1x1x32xf32>
    %152 = vector.shape_cast %151 : vector<1x1x32xf32> to vector<1x32xf32>
    %153 = vector.broadcast %152 : vector<1x32xf32> to vector<8x32xf32>
    %154 = arith.addf %150, %153 : vector<8x32xf32>
    %155 = arith.addf %138, %154 : vector<8x32xf32>
    %c0_77 = arith.constant 0 : index
    %c0_78 = arith.constant 0 : index
    %c0_79 = arith.constant 0 : index
    %156 = vector.load %arg14[%c0_77, %c0_78, %c0_79] : memref<1x1x32xf32, #tpu.memory_space<vmem>>, vector<1x1x32xf32>
    %157 = vector.shape_cast %156 : vector<1x1x32xf32> to vector<1x32xf32>
    %c0_80 = arith.constant 0 : index
    %c0_81 = arith.constant 0 : index
    %c0_82 = arith.constant 0 : index
    %158 = vector.load %arg15[%c0_80, %c0_81, %c0_82] : memref<1x1x32xf32, #tpu.memory_space<vmem>>, vector<1x1x32xf32>
    %159 = vector.shape_cast %158 : vector<1x1x32xf32> to vector<1x32xf32>
    %cst_83 = arith.constant dense<0.000000e+00> : vector<8xf32>
    %160 = vector.multi_reduction <add>, %155, %cst_83 [1] : vector<8x32xf32> to vector<8xf32>
    %161 = vector.shape_cast %160 : vector<8xf32> to vector<8x1xf32>
    %cst_84 = arith.constant 3.200000e+01 : f32
    %162 = vector.broadcast %cst_84 : f32 to vector<8x1xf32>
    %163 = arith.divf %161, %162 : vector<8x1xf32>
    %164 = vector.broadcast %163 : vector<8x1xf32> to vector<8x32xf32>
    %165 = arith.subf %155, %164 : vector<8x32xf32>
    %166 = arith.mulf %165, %165 : vector<8x32xf32>
    %cst_85 = arith.constant dense<0.000000e+00> : vector<8xf32>
    %167 = vector.multi_reduction <add>, %166, %cst_85 [1] : vector<8x32xf32> to vector<8xf32>
    %168 = vector.shape_cast %167 : vector<8xf32> to vector<8x1xf32>
    %cst_86 = arith.constant 3.200000e+01 : f32
    %169 = vector.broadcast %cst_86 : f32 to vector<8x1xf32>
    %170 = arith.divf %168, %169 : vector<8x1xf32>
    %171 = vector.broadcast %163 : vector<8x1xf32> to vector<8x32xf32>
    %172 = arith.subf %155, %171 : vector<8x32xf32>
    %cst_87 = arith.constant 9.99999974E-6 : f32
    %173 = vector.broadcast %cst_87 : f32 to vector<8x1xf32>
    %174 = arith.addf %170, %173 : vector<8x1xf32>
    %175 = math.rsqrt %174 : vector<8x1xf32>
    %176 = vector.broadcast %175 : vector<8x1xf32> to vector<8x32xf32>
    %177 = arith.mulf %172, %176 : vector<8x32xf32>
    %178 = vector.broadcast %157 : vector<1x32xf32> to vector<8x32xf32>
    %179 = arith.mulf %177, %178 : vector<8x32xf32>
    %180 = vector.broadcast %159 : vector<1x32xf32> to vector<8x32xf32>
    %181 = arith.addf %179, %180 : vector<8x32xf32>
    %182 = vector.shape_cast %181 : vector<8x32xf32> to vector<1x8x32xf32>
    %c0_88 = arith.constant 0 : index
    %c0_89 = arith.constant 0 : index
    %c0_90 = arith.constant 0 : index
    %183 = vector.load %arg18[%c0_88, %c0_89, %c0_90] : memref<1x8x32xf32, #tpu.memory_space<vmem>>, vector<1x8x32xf32>
    tpu.vector_store %arg18[%c0_88, %c0_89, %c0_90], %182 {strides = array<i32>} : memref<1x8x32xf32, #tpu.memory_space<vmem>>, vector<1x8x32xf32>,
    %c1_i32 = arith.constant 1 : i32
    %184 = arith.cmpi eq, %arg1, %c1_i32 : i32
    %185 = arith.extui %184 : i1 to i32
    %c0_i32_91 = arith.constant 0 : i32
    %186 = arith.cmpi ne, %185, %c0_i32_91 : i32
    scf.if %186 {
      %c0_92 = arith.constant 0 : index
      %c0_93 = arith.constant 0 : index
      %187 = vector.load %arg16[%c0_92, %c0_93] : memref<1x32xf32, #tpu.memory_space<vmem>>, vector<1x32xf32>
      %c0_94 = arith.constant 0 : index
      %c0_95 = arith.constant 0 : index
      %188 = vector.load %arg17[%c0_94, %c0_95] : memref<1x32xf32, #tpu.memory_space<vmem>>, vector<1x32xf32>
      %cst_96 = arith.constant dense<0.000000e+00> : vector<8xf32>
      %189 = vector.multi_reduction <add>, %181, %cst_96 [1] : vector<8x32xf32> to vector<8xf32>
      %190 = vector.shape_cast %189 : vector<8xf32> to vector<8x1xf32>
      %cst_97 = arith.constant 3.200000e+01 : f32
      %191 = vector.broadcast %cst_97 : f32 to vector<8x1xf32>
      %192 = arith.divf %190, %191 : vector<8x1xf32>
      %193 = vector.broadcast %192 : vector<8x1xf32> to vector<8x32xf32>
      %194 = arith.subf %181, %193 : vector<8x32xf32>
      %195 = arith.mulf %194, %194 : vector<8x32xf32>
      %cst_98 = arith.constant dense<0.000000e+00> : vector<8xf32>
      %196 = vector.multi_reduction <add>, %195, %cst_98 [1] : vector<8x32xf32> to vector<8xf32>
      %197 = vector.shape_cast %196 : vector<8xf32> to vector<8x1xf32>
      %cst_99 = arith.constant 3.200000e+01 : f32
      %198 = vector.broadcast %cst_99 : f32 to vector<8x1xf32>
      %199 = arith.divf %197, %198 : vector<8x1xf32>
      %200 = vector.broadcast %192 : vector<8x1xf32> to vector<8x32xf32>
      %201 = arith.subf %181, %200 : vector<8x32xf32>
      %cst_100 = arith.constant 9.99999974E-6 : f32
      %202 = vector.broadcast %cst_100 : f32 to vector<8x1xf32>
      %203 = arith.addf %199, %202 : vector<8x1xf32>
      %204 = math.rsqrt %203 : vector<8x1xf32>
      %205 = vector.broadcast %204 : vector<8x1xf32> to vector<8x32xf32>
      %206 = arith.mulf %201, %205 : vector<8x32xf32>
      %207 = vector.broadcast %187 : vector<1x32xf32> to vector<8x32xf32>
      %208 = arith.mulf %206, %207 : vector<8x32xf32>
      %209 = vector.broadcast %188 : vector<1x32xf32> to vector<8x32xf32>
      %210 = arith.addf %208, %209 : vector<8x32xf32>
      %211 = vector.shape_cast %210 : vector<8x32xf32> to vector<1x8x32xf32>
      %c0_101 = arith.constant 0 : index
      %c0_102 = arith.constant 0 : index
      %c0_103 = arith.constant 0 : index
      %212 = vector.load %arg18[%c0_101, %c0_102, %c0_103] : memref<1x8x32xf32, #tpu.memory_space<vmem>>, vector<1x8x32xf32>
      tpu.vector_store %arg18[%c0_101, %c0_102, %c0_103], %211 {strides = array<i32>} : memref<1x8x32xf32, #tpu.memory_space<vmem>>, vector<1x8x32xf32>,
    } else {
    }
    return
  }
  func.func @transform_0(%arg0: i32, %arg1: i32) -> (i32, i32, i32) {
    %c0_i32 = arith.constant 0 : i32
    %c0_i32_0 = arith.constant 0 : i32
    %c0_i32_1 = arith.constant 0 : i32
    return %arg0, %c0_i32, %c0_i32_0 : i32, i32, i32
  }
  func.func @transform_1(%arg0: i32, %arg1: i32) -> (i32, i32, i32) {
    %c0_i32 = arith.constant 0 : i32
    %c0_i32_0 = arith.constant 0 : i32
    %c0_i32_1 = arith.constant 0 : i32
    return %arg0, %c0_i32, %c0_i32_0 : i32, i32, i32
  }
  func.func @transform_2(%arg0: i32, %arg1: i32) -> (i32, i32, i32) {
    %c0_i32 = arith.constant 0 : i32
    %c0_i32_0 = arith.constant 0 : i32
    %c0_i32_1 = arith.constant 0 : i32
    return %arg1, %c0_i32, %c0_i32_0 : i32, i32, i32
  }
  func.func @transform_3(%arg0: i32, %arg1: i32) -> (i32, i32, i32) {
    %c0_i32 = arith.constant 0 : i32
    %c0_i32_0 = arith.constant 0 : i32
    %c0_i32_1 = arith.constant 0 : i32
    return %arg1, %c0_i32, %c0_i32_0 : i32, i32, i32
  }
  func.func @transform_4(%arg0: i32, %arg1: i32) -> (i32, i32, i32) {
    %c0_i32 = arith.constant 0 : i32
    %c0_i32_0 = arith.constant 0 : i32
    %c0_i32_1 = arith.constant 0 : i32
    return %arg1, %c0_i32, %c0_i32_0 : i32, i32, i32
  }
  func.func @transform_5(%arg0: i32, %arg1: i32) -> (i32, i32, i32) {
    %c0_i32 = arith.constant 0 : i32
    %c0_i32_0 = arith.constant 0 : i32
    %c0_i32_1 = arith.constant 0 : i32
    return %arg1, %c0_i32, %c0_i32_0 : i32, i32, i32
  }
  func.func @transform_6(%arg0: i32, %arg1: i32) -> (i32, i32, i32) {
    %c0_i32 = arith.constant 0 : i32
    %c0_i32_0 = arith.constant 0 : i32
    %c0_i32_1 = arith.constant 0 : i32
    return %arg1, %c0_i32, %c0_i32_0 : i32, i32, i32
  }
  func.func @transform_7(%arg0: i32, %arg1: i32) -> (i32, i32, i32) {
    %c0_i32 = arith.constant 0 : i32
    %c0_i32_0 = arith.constant 0 : i32
    %c0_i32_1 = arith.constant 0 : i32
    return %arg1, %c0_i32, %c0_i32_0 : i32, i32, i32
  }
  func.func @transform_8(%arg0: i32, %arg1: i32) -> (i32, i32, i32) {
    %c0_i32 = arith.constant 0 : i32
    %c0_i32_0 = arith.constant 0 : i32
    %c0_i32_1 = arith.constant 0 : i32
    return %arg1, %c0_i32, %c0_i32_0 : i32, i32, i32
  }
  func.func @transform_9(%arg0: i32, %arg1: i32) -> (i32, i32, i32) {
    %c0_i32 = arith.constant 0 : i32
    %c0_i32_0 = arith.constant 0 : i32
    %c0_i32_1 = arith.constant 0 : i32
    return %arg1, %c0_i32, %c0_i32_0 : i32, i32, i32
  }
  func.func @transform_10(%arg0: i32, %arg1: i32) -> (i32, i32, i32) {
    %c0_i32 = arith.constant 0 : i32
    %c0_i32_0 = arith.constant 0 : i32
    %c0_i32_1 = arith.constant 0 : i32
    return %arg1, %c0_i32, %c0_i32_0 : i32, i32, i32
  }
  func.func @transform_11(%arg0: i32, %arg1: i32) -> (i32, i32, i32) {
    %c0_i32 = arith.constant 0 : i32
    %c0_i32_0 = arith.constant 0 : i32
    %c0_i32_1 = arith.constant 0 : i32
    return %arg1, %c0_i32, %c0_i32_0 : i32, i32, i32
  }
  func.func @transform_12(%arg0: i32, %arg1: i32) -> (i32, i32, i32) {
    %c0_i32 = arith.constant 0 : i32
    %c0_i32_0 = arith.constant 0 : i32
    %c0_i32_1 = arith.constant 0 : i32
    return %arg1, %c0_i32, %c0_i32_0 : i32, i32, i32
  }
  func.func @transform_13(%arg0: i32, %arg1: i32) -> (i32, i32, i32) {
    %c0_i32 = arith.constant 0 : i32
    %c0_i32_0 = arith.constant 0 : i32
    %c0_i32_1 = arith.constant 0 : i32
    return %arg1, %c0_i32, %c0_i32_0 : i32, i32, i32
  }
  func.func @transform_14(%arg0: i32, %arg1: i32) -> (i32, i32) {
    %c0_i32 = arith.constant 0 : i32
    %c0_i32_0 = arith.constant 0 : i32
    %c0_i32_1 = arith.constant 0 : i32
    return %c0_i32, %c0_i32_0 : i32, i32
  }
  func.func @transform_15(%arg0: i32, %arg1: i32) -> (i32, i32) {
    %c0_i32 = arith.constant 0 : i32
    %c0_i32_0 = arith.constant 0 : i32
    %c0_i32_1 = arith.constant 0 : i32
    return %c0_i32, %c0_i32_0 : i32, i32
  }
  func.func @transform_16(%arg0: i32, %arg1: i32) -> (i32, i32, i32) {
    %c0_i32 = arith.constant 0 : i32
    %c0_i32_0 = arith.constant 0 : i32
    %c0_i32_1 = arith.constant 0 : i32
    return %arg0, %c0_i32, %c0_i32_0 : i32, i32, i32
  }
  func.func @transform_17(%arg0: i32, %arg1: i32) -> (i32, i32, i32, i32) {
    %c2_i32 = arith.constant 2 : i32
    %0 = arith.muli %arg1, %c2_i32 : i32
    %1 = arith.addi %0, %arg0 : i32
    %c0_i32 = arith.constant 0 : i32
    %c0_i32_0 = arith.constant 0 : i32
    %c0_i32_1 = arith.constant 0 : i32
    %c0_i32_2 = arith.constant 0 : i32
    return %1, %c0_i32, %c0_i32_0, %c0_i32_1 : i32, i32, i32, i32
  }
}

</mosaic_0001>

<bundles_post_ra>
// kernel: tpu_custom_call.1
= control target key start
LH: loop header
LB: loop body
LE: loop exit
PB: predicated region body
PF: predicated region fallthrough
CT: control target
= control target key end

     0   :  { %s3053_s0 = inlined_call_operand.hbm [shape: f32[2,1,8], index: 0, kind: input, shape index: {}]   ;;  %s3054_s1 = inlined_call_operand.hbm [shape: f32[2,8,32], index: 1, kind: input, shape index: {}]   ;;  %s3055_s2 = inlined_call_operand.vmem [shape: f32[2,32,96], index: 2, kind: input, shape index: {}]   ;;  %s3056_s3 = inlined_call_operand.vmem [shape: f32[2,1,96], index: 3, kind: input, shape index: {}]   ;;  %s3057_s4 = inlined_call_operand.vmem [shape: f32[2,32,32], index: 4, kind: input, shape index: {}]   ;;  %s3058_s5 = inlined_call_operand.hbm [shape: f32[2,1,32], index: 5, kind: input, shape index: {}]   ;;  %s3059_s6 = inlined_call_operand.vmem [shape: f32[2,1,32], index: 6, kind: input, shape index: {}]   ;;  %s3060_s7 = inlined_call_operand.hbm [shape: f32[2,1,32], index: 7, kind: input, shape index: {}]   ;;  %s3061_s8 = inlined_call_operand.vmem [shape: f32[2,32,64], index: 8, kind: input, shape index: {}]   ;;  %s3062_s9 = inlined_call_operand.vmem [shape: f32[2,1,64], index: 9, kind: input, shape index: {}]   ;;  %s3063_s10 = inlined_call_operand.vmem [shape: f32[2,64,32], index: 10, kind: input, shape index: {}]   ;;  %s3064_s11 = inlined_call_operand.vmem [shape: f32[2,1,32], index: 11, kind: input, shape index: {}]   ;;  %s3065_s12 = inlined_call_operand.vmem [shape: f32[2,1,32], index: 12, kind: input, shape index: {}]   ;;  %s3066_s13 = inlined_call_operand.hbm [shape: f32[2,1,32], index: 13, kind: input, shape index: {}]   ;;  %s3067_s14 = inlined_call_operand.vmem [shape: f32[1,32], index: 14, kind: input, shape index: {}]   ;;  %s3068_s15 = inlined_call_operand.vmem [shape: f32[1,32], index: 15, kind: input, shape index: {}]   ;;  %s3069_s16 = inlined_call_operand.hbm [shape: f32[2,8,32], index: 16, kind: output, shape index: {0}]   ;;  %s3070_s17 = inlined_call_operand.hbm [shape: f32[4,4,8,8], index: 17, kind: output, shape index: {1}]  }
   0x1   :  { %3100 = sst [smem:[#allocation41_spill]] %s3053_s0 }
   0x2   :  { %3101 = sst [smem:[#allocation42_spill]] %s3054_s1 }
   0x3   :  { %3102 = sst [smem:[#allocation43_spill]] %s3055_s2 }
   0x4   :  { %3103 = sst [smem:[#allocation44_spill]] %s3056_s3 }
   0x5   :  { %3104 = sst [smem:[#allocation45_spill]] %s3057_s4 }
   0x6   :  { %3105 = sst [smem:[#allocation46_spill]] %s3058_s5 }
   0x7   :  { %3106 = sst [smem:[#allocation47_spill]] %s3059_s6 }
   0x8   :  { %3107 = sst [smem:[#allocation48_spill]] %s3060_s7 }
   0x9   :  { %3108 = sst [smem:[#allocation49_spill]] %s3061_s8 }
   0xa   :  { %3109 = sst [smem:[#allocation50_spill]] %s3062_s9 }
   0xb   :  { %3110 = sst [smem:[#allocation51_spill]] %s3063_s10 }
   0xc   :  { %3111 = sst [smem:[#allocation52_spill]] %s3064_s11 }
   0xd   :  { %3112 = sst [smem:[#allocation53_spill]] %s3065_s12 }
   0xe   :  { %3113 = sst [smem:[#allocation54_spill]] %s3066_s13 }
   0xf   :  { %3114 = sst [smem:[#allocation55_spill]] %s3067_s14 }
  0x10   :  { %3115 = sst [smem:[#allocation56_spill]] %s3068_s15 }
  0x11   :  { %3116 = sst [smem:[#allocation57_spill]] %s3069_s16 }
  0x12   :  { %3117 = sst [smem:[#allocation58_spill]] %s3070_s17 }
  0x13   :  { %23 = vsyncpa [#allocation3], 0 }
  0x14   :  { %25 = vsyncpa [#allocation3 + $0x1], 0 }
  0x15   :  { %26 = vsyncpa [#allocation6], 0 }
  0x16   :  { %28 = vsyncpa [#allocation6 + $0x1], 0 }
  0x17   :  { %29 = vsyncpa [#allocation9], 0 }
  0x18   :  { %31 = vsyncpa [#allocation9 + $0x1], 0 }
  0x19   :  { %32 = vsyncpa [#allocation4], 0 }
  0x1a   :  { %34 = vsyncpa [#allocation4 + $0x1], 0 }
  0x1b   :  { %35 = vsyncpa [#allocation13], 0 }
  0x1c   :  { %37 = vsyncpa [#allocation13 + $0x1], 0  ;;  %s2506_s24 = smov 0   ;;  %s2508_s25 = smov 0  }
  0x1d   :  { %s2510_s26 = smov 0   ;;  %s2512_s27 = smov 0  }
  0x1e   :  { %s2514_s28 = smov 0   ;;  %s2516_s29 = smov 0  }
  0x1f   :  { %s2518_s0 = smov 0   ;;  %s2520_s30 = smov 0  }
  0x20   :  { %s2522_s18 = smov 0   ;;  %s2524_s19 = smov 0  }
  0x21   :  { %s2526_s1 = smov 0   ;;  %s2528_s20 = smov 0  }
  0x22   :  { %s2530_s21 = smov 0   ;;  %s2532_s22 = smov 0  }
  0x23 LB: > { %3118 = sst [smem:[#allocation20_spill]] %s2345_s24  ;;  %s2577_s23 = sadd.s32 4294967295, %s2397_s22   ;;  %s2397_s22 = sphi %s2532_s22, %s43_s22   ;;  %s2393_s21 = sphi %s2530_s21, %s3213_s21   ;;  %s2389_s20 = sphi %s2528_s20, %s3212_s20   ;;  %s2385_s1 = sphi %s2526_s1, %s3211_s1   ;;  %s2381_s19 = sphi %s2524_s19, %s3210_s19   ;;  %s2377_s18 = sphi %s2522_s18, %s3209_s18   ;;  %s2373_s30 = sphi %s2520_s30, %s3208_s30   ;;  %s2369_s0 = sphi %s2518_s0, %s3207_s0   ;;  %s2365_s29 = sphi %s2516_s29, %s3206_s29   ;;  %s2361_s28 = sphi %s2514_s28, %s3205_s28   ;;  %s2357_s27 = sphi %s2512_s27, %s3204_s27   ;;  %s2353_s26 = sphi %s2510_s26, %s3216_s26   ;;  %s2349_s25 = sphi %s2508_s25, %s3215_s25   ;;  %s2345_s24 = sphi %s2506_s24, %s3202_s24  }
  0x24   : > { %3119 = sst [smem:[#allocation21_spill]] %s2349_s25  ;;  %s1800_s17 = sadd.s32 4294967294, %s2397_s22  }
  0x25   : > { %3120 = sst [smem:[#allocation22_spill]] %s2361_s28  ;;  %p69_p0 = scmp.ne.s32.totalorder %s2377_s18, %s2373_s30 }
  0x26   : > { %3121 = sst [smem:[#allocation23_spill]] %s2365_s29  ;;  %p70_p1 = scmp.eq.s32.totalorder %s2397_s22, 0 }
  0x27   : > { %3122 = sst [smem:[#allocation24_spill]] %s2369_s0  ;;  %p75_p2 = scmp.ne.s32.totalorder %s2373_s30, %s2369_s0 }
  0x28   : > { %3123 = sst [smem:[#allocation25_spill]] %s2373_s30  ;;  %p3075_p3 = scmp.eq.s32.totalorder %s2577_s23, 0 }
  0x29   : > { %3124 = sst [smem:[#allocation26_spill]] %s2377_s18  ;;  %p2590_p4 = por %p70_p1, %p69_p0 }
  0x2a   : > { %3125 = sst [smem:[#allocation27_spill]] %s2381_s19  ;;  %p479_p5 = scmp.eq.s32.totalorder %s2577_s23, 3 }
  0x2b   : > { %3126 = sst [smem:[#allocation28_spill]] %s2385_s1  ;;  %p2597_p6 = por %p3075_p3, %p75_p2 }
  0x2c   : > { %3127 = sst [smem:[#allocation29_spill]] %s2389_s20  ;;  %p485_p7 = scmp.eq.s32.totalorder %s1800_s17, 3 }
  0x2d   : > { %3128 = sst [smem:[#allocation30_spill]] %s2393_s21  ;;  %p2601_p8 = por %p479_p5, %p69_p0 }
  0x2e   : > { %p2606_p9 = por %p485_p7, %p75_p2  ;;  %p508_p10 = scmp.ne.s32.totalorder %s2353_s26, %s2349_s25 }
  0x2f   : > { %s3131_s1 = scalar_select %p2601_p8, 1, 0 }
  0x30   : > { %s3133_s14 = scalar_select %p2606_p9, 1, 0 }
  0x31   : > { %3132 = sst [smem:[#allocation31_spill]] %s3131_s1  ;;  %p514_p11 = scmp.ne.s32.totalorder %s2349_s25, %s2345_s24 }
  0x32   : > { %3134 = sst [smem:[#allocation32_spill]] %s3133_s14  ;;  %p2614_p12 = por %p508_p10, %p479_p5 }
  0x33   : > { %p3083_p13 = scmp.lt.s32.totalorder %s2397_s22, 4  ;;  %p2619_p3 = por %p514_p11, %p485_p7 }
  0x34   : > { %s3135_s12 = scalar_select %p2614_p12, 1, 0 }
  0x35   : > { %s3137_s17 = scalar_select %p2619_p3, 1, 0 }
  0x36   : > { %3136 = sst [smem:[#allocation33_spill]] %s3135_s12  ;;  %s2624_s1 = sand.u32 1, %s2377_s18  }
  0x37   : > { %3138 = sst [smem:[#allocation34_spill]] %s3137_s17  ;;  %p2630_p0 = pnand %p3083_p13, %p2590_p4 }
  0x38   : > { %s3084_s24 = sand.u32 1, %s2397_s22   ;;  %s1805_s14 = sshll.u32 %s2624_s1, 3 }
  0x39   : > { %s1806_s12 = sshll.u32 %s2393_s21, 3  ;;  %s562_s17 = scalar_lea.vmem [#allocation5], %s1805_s14 }
  0x3a   : > { %s570_s11 = sshll.u32 %s562_s17, 4  ;;  %s3140_s9 = sld [smem:[#allocation42_spill]]  ;;  %s571_s11 = int_to_ptr.vmem [resolvable:$true] %s570_s11 }
  0x3b   : > { %p1807_p2 = scmp.ge.s32.totalorder %s2397_s22, 1  ;;  %p688_p4 = scmp.lt.s32.totalorder %s2397_s22, 5 }
  0x3c   : > { %s2644_s4 = scalar_lea.sflag [#allocation6], %s3084_s24  ;;  %p199_p10 = scmp.ne.s32.totalorder %s2365_s29, %s2361_s28 }
  0x3d   : > { %p2649_p5 = pnand %p1807_p2, %p688_p4  ;;  %p205_p11 = scmp.ne.s32.totalorder %s2361_s28, %s2357_s27 }
  0x3e   : > { %p2668_p2 = por %p199_p10, %p70_p1  ;;  %p3145_p3 = scmp.eq.s32.totalorder %s2577_s23, 0 }
  0x3f   : > { %s1801_s27 = sshll.u32 %s2389_s20, 1  ;;  %s2690_s3 = sand.u32 1, %s2365_s29  }
  0x40   : > { %s566_s8 = scalar_lea.hbm %s3140_s9, %s1806_s12  ;;  %s52_s9 = sadd.s32 1, %s2389_s20 }
  0x41   : > { %s568_s6 = sshll.u32 %s566_s8, 4  ;;  %p53_p7 = scmp.ge.s32.totalorder %s52_s9, 2  ;;  %s569_s6 = int_to_ptr.hbm [resolvable:$true] %s568_s6 }
  0x42   : > { %1873 = dma.hbm_to_vmem [thread:$0]  (!%p2630_p0), %s569_s6, 128, %s571_s11, %s2644_s4  }
  0x43   : > { %s192_s8 = sadd.s32 1, %s2365_s29  ;;  %s3218_s9 = smov (%p53_p7, %s52_s9), 0 }
  0x44   : > { %3142 = sst [smem:[#allocation35_spill]] %s3218_s9  ;;  %s3143_s12 = sadd.s32 1, %s2393_s21 }
  0x45   : > { %s3220_s12 = smov (!%p53_p7, %s3143_s12), %s2393_s21  ;;  %s189_s6 = ssub.s32 %s2389_s20, %s3218_s9 }
  0x46   : > { %p57_p4 = scmp.ge.s32.totalorder %s3220_s12, 2  ;;  %p190_p13 = scmp.eq.s32.totalorder %s189_s6, 0 }
  0x47   : > { %p2674_p9 = por %p205_p11, %p3145_p3  ;;  %s492_s24 = sadd.s32 %s2393_s21, %s1801_s27 }
  0x48   : > { %s3222_s12 = smov (%p57_p4, %s3220_s12), 0  ;;  %s1802_s2 = sshll.u32 %s3218_s9, 1 }
  0x49   : > { %s3146_s14 = scalar_select %p2674_p9, 1, 0 }
  0x4a   : > { %3148 = sst [smem:[#allocation37_spill]] %s3222_s12  ;;  %s59_s15 = ssub.s32 %s2393_s21, %s3222_s12 }
  0x4b   : > { %3147 = sst [smem:[#allocation36_spill]] %s3146_s14  ;;  %p60_p1 = scmp.eq.s32.totalorder %s59_s15, 0 }
  0x4c   : > { %s2682_s17 = scalar_select %p190_p13, %s2365_s29, %s192_s8  }
  0x4d   : > { %s494_s6 = sadd.s32 %s1802_s2, %s3222_s12  ;;  %s3150_s19 = sadd.s32 1, %s2377_s18 }
  0x4e   : > { %3149 = sst [smem:[#allocation38_spill]] %s2682_s17  ;;  %s495_s14 = ssub.s32 %s492_s24, %s494_s6 }
  0x4f   : > { %s2695_s25 = scalar_select %p60_p1, %s2377_s18, %s3150_s19  }
  0x50   : > { %p3152_p3 = scmp.lt.s32.totalorder %s2397_s22, 4  ;;  %p496_p13 = scmp.eq.s32.totalorder %s495_s14, 0 }
  0x51   : > { %3151 = sst [smem:[#allocation39_spill]] %s2695_s25  ;;  %s3154_s27 = sadd.s32 1, %s2353_s26 }
  0x52   : > { %p2701_p7 = pnand %p3152_p3, %p2668_p2  ;;  %s3156_s7 = sld [smem:[#allocation48_spill]] }
  0x53   : > { %s2708_s15 = scalar_select %p496_p13, %s2353_s26, %s3154_s27  }
  0x54   : > { %s625_s19 = scalar_lea.vmem [#allocation8], %s2690_s3  ;;  %s3157_s6 = sand.u32 1, %s2397_s22  }
  0x55   : > { %3155 = sst [smem:[#allocation40_spill]] %s2708_s15  ;;  %s632_s24 = sshll.u32 %s625_s19, 4  ;;  %s633_s24 = int_to_ptr.vmem [resolvable:$true] %s632_s24 }
  0x56   : > { %s623_s25 = scalar_lea.sflag [#allocation9], %s3157_s6  ;;  %s3158_s18 = sld [smem:[#allocation41_spill]] }
  0x57   : > { %s3159_s5 = sld [smem:[#allocation46_spill]] }
  0x58   : > { %s628_s9 = scalar_lea.hbm %s3156_s7, %s2389_s20  ;;  %s544_s7 = scalar_lea.vmem [#allocation2], %s2624_s1 }
  0x59   : > { %s630_s11 = sshll.u32 %s628_s9, 4  ;;  %s551_s17 = sshll.u32 %s544_s7, 4  ;;  %s631_s11 = int_to_ptr.hbm [resolvable:$true] %s630_s11  ;;  %s552_s17 = int_to_ptr.vmem [resolvable:$true] %s551_s17 }
  0x5a   : > { %1879 = dma.hbm_to_vmem [thread:$0]  (!%p2701_p7), %s631_s11, 16, %s633_s24, %s623_s25  }
  0x5b   : > { %s542_s9 = scalar_lea.sflag [#allocation3], %s2624_s1  ;;  %s602_s11 = scalar_lea.vmem [#allocation7], %s2690_s3 }
  0x5c   : > { %s547_s12 = scalar_lea.hbm %s3158_s18, %s2393_s21  ;;  %s609_s15 = sshll.u32 %s602_s11, 4  ;;  %s610_s15 = int_to_ptr.vmem [resolvable:$true] %s609_s15 }
  0x5d   : > { %s549_s2 = sshll.u32 %s547_s12, 4  ;;  %s605_s29 = scalar_lea.hbm %s3159_s5, %s2389_s20  ;;  %s550_s2 = int_to_ptr.hbm [resolvable:$true] %s549_s2 }
  0x5e   : > { %1870 = dma.hbm_to_vmem [thread:$0]  (!%p2630_p0), %s550_s2, 16, %s552_s17, %s542_s9  }
  0x5f   : > { %s607_s24 = sshll.u32 %s605_s29, 4  ;;  %s3160_s13 = sld [smem:[#allocation54_spill]]  ;;  %s608_s24 = int_to_ptr.hbm [resolvable:$true] %s607_s24 }
  0x60   : > { %1876 = dma.hbm_to_vmem [thread:$0]  (!%p2701_p7), %s608_s24, 16, %s610_s15, %s2644_s4  }
  0x61   : > { %s676_s12 = scalar_lea.vmem [#allocation10], %s2690_s3  ;;  %s2745_s29 = sand.u32 (!%p2649_p5), 1, %s2373_s30  }
  0x62   : > { %s683_s1 = sshll.u32 %s676_s12, 4  ;;  %s695_s4 = scalar_lea.sflag (!%p2649_p5), [#allocation3], %s2745_s29  ;;  %s684_s1 = int_to_ptr.vmem [resolvable:$true] %s683_s1 }
  0x63   : > { %692 = sbr.rel (%p2649_p5) target bundleno = 2803 (0xaf3), region = 84  ;;  %s697_s0 = scalar_lea.vmem (!%p2649_p5), [#allocation2], %s2745_s29 }
  0x65   : > { %s679_s7 = scalar_lea.hbm %s3160_s13, %s2389_s20 }
  0x66   : > { %s681_s27 = sshll.u32 %s679_s7, 4  ;;  %s682_s27 = int_to_ptr.hbm [resolvable:$true] %s681_s27 }
  0x67   : > { %1882 = dma.hbm_to_vmem [thread:$0]  (!%p2701_p7), %s682_s27, 16, %s684_s1, %s623_s25  }
  0x68   : > { %2320 = dma.done.wait (%p2597_p6), %s695_s4, 16  }
  0x69   : > { %2322 = vsyncadd (%p2597_p6), %s695_s4, 4294967280  ;;  %s703_s3 = sand.u32 1, %s2577_s23   ;;  %s3095_s25 = sshll.u32 %s2745_s29, 3 }
  0x6a   : > { %s704_s10 = scalar_lea.sflag [#allocation6], %s703_s3  ;;  %s2757_s17 = scalar_lea.vmem [#allocation5], %s3095_s25 }
  0x6b   : > { %2324 = dma.done.wait (%p2597_p6), %s704_s10, 128  }
  0x6c   : > { %2326 = vsyncadd (%p2597_p6), %s704_s10, 4294967168  ;;  %s2764_s15 = sand.u32 1, %s2361_s28  }
  0x6d   : > { %2328 = dma.done.wait (%p2674_p9), %s704_s10, 16  }
  0x6e   : > { %2330 = vsyncadd (%p2674_p9), %s704_s10, 4294967280  ;;  %s723_s23 = scalar_lea.sflag [#allocation9], %s703_s3 }
  0x6f   : > { %2332 = dma.done.wait (%p2674_p9), %s723_s23, 32  }
  0x70   : > { %2334 = vsyncadd (%p2674_p9), %s723_s23, 4294967264  ;;  %s3162_s16 = sld [smem:[#allocation21_spill]]  ;;  %v881_v0 = vlaneseq  ;;  %v2022_v2 = vld [vmem:[%s697_s0] ss:$0 sm:$0xff]  ;;  %v2399_v4 = vmov -1e+09  }
  0x71   : > { %s3163_s19 = sld [smem:[#allocation27_spill]]  ;;  %s734_s21 = scalar_lea.vmem [#allocation10], %s2764_s15 }
  0x72   : > { %v882_v1 = vshrl.u32 %v881_v0, 7  ;;  %s3165_s3 = sld [smem:[#allocation43_spill]] }
  0x73   : > { %s3168_s14 = sld [smem:[#allocation49_spill]] }
  0x74   : > { %2021 = vset.pattern.permute.xlu0 %v882_v1  ;;  %s3169_s4 = sld [smem:[#allocation50_spill]] }
  0x75   : > { %s3170_s23 = sld [smem:[#allocation51_spill]] }
  0x76   : > { %s3094_s6 = sand.u32 1, %s3162_s16   ;;  %s3166_s16 = sld [smem:[#allocation45_spill]] }
  0x77   : > { %p842_p6 = scmp.lt.s32.totalorder %s3163_s19, 1  ;;  %s1810_s24 = sshll.u32 %s3094_s6, 5 }
  0x78   : > { %s3171_s28 = sld [smem:[#allocation52_spill]]  ;;  %s2830_s20 = scalar_lea.vmem [#allocation12], %s1810_s24 }
  0x79   : > { %s2781_s11 = scalar_select %p842_p6, %s3163_s19, 1 }
  0x7a   : > { %s3172_s5 = sld [smem:[#allocation53_spill]]  ;;  %p1819_p9 = scmp.ne.s32.totalorder %s3163_s19, 0 }
  0x7b   : > { %s1848_s18 = sshll.u32 %s2781_s11, 5  ;;  %s1851_s12 = sshll.u32 %s2781_s11, 6 }
  0x7c   : > { %s846_s10 = scalar_lea.vmem %s3165_s3, %s1848_s18  ;;  %s2794_s6 = scalar_lea.vmem %s3166_s16, %s1848_s18  ;;  %885 = vperm.xlu0 %2021, %v2022_v2  }
  0x7d   : > { %s2803_s7 = scalar_lea.vmem %s3168_s14, %s1848_s18  ;;  %s865_s3 = scalar_lea.vmem %s3169_s4, %s2781_s11 }
  0x7e   : > { %s2813_s16 = scalar_lea.vmem %s3170_s23, %s1851_s12  ;;  %s873_s2 = scalar_lea.vmem %s3171_s28, %s2781_s11 }
  0x7f   : > { %s3173_s18 = sshll.u32 %s2745_s29, 3 }
  0x80   : > { %s876_s13 = scalar_lea.vmem %s3172_s5, %s2781_s11  ;;  %s2828_s14 = scalar_lea.vmem [#allocation11], %s3173_s18 }
  0xec   : > { %895 = sbr.rel (%p1819_p9) target bundleno = 243 (0xf3), region = 108 }
  0xee   : > { %v886_v3 = vpop.permute.xlu0 %885 }
  0xef   : > { %vm890_vm0 = vcmp.eq.f32.partialorder %v886_v3, %v2022_v2 }
  0xf0   : > { %v2823_v5 = vsel %vm890_vm0, 0.0, %v2399_v4 }
  0xf1   : > { %v896_v6 = vld [vmem:[%s2757_s17] sm:$0xff]  ;;  %vm897_vm1 = vcmask 261120  }
  0xf2   : > { %898 = vst.msk [vmem:[%s2828_s14] sm:$0xff] %vm897_vm1, %v896_v6 }
  0xf3 PF: > { %v903_v7 = vld [vmem:[%s846_s10 + $0x18] sm:$0xff]  ;;  %v902_v8 = vld [vmem:[%s846_s10 + $0x10] sm:$0xff]  ;;  %v901_v9 = vld [vmem:[%s846_s10 + $0x8] sm:$0xff]  ;;  %vm908_vm2 = vcmask 261120   ;;  %s3174_s30 = sld [smem:[#allocation44_spill]]  ;;  %s2400_s19 = smov 64  }
  0xf4   : > { %924 = vmatpush.msra.mxu0 %v903_v7  ;;  %v900_v10 = vld [vmem:[%s846_s10] sm:$0xff]  ;;  %s2401_s24 = smov 96   ;;  %s2402_s12 = smov 120   ;;  %vm936_vm3 = vcmask 64512  }
  0xf5   : > { %s2403_s10 = smov 56   ;;  %s2404_s27 = smov 88  }
  0xf6   : > { %925 = vmatpush.msra.mxu0 %v902_v8  ;;  %s2405_s1 = smov 104   ;;  %s2406_s4 = smov 72  }
  0xf7   : > { %s2407_s8 = smov 80   ;;  %s2408_s23 = smov 112  }
  0xf8   : > { %926 = vmatpush.msra.mxu0 %v901_v9  ;;  %s2409_s0 = smov 40   ;;  %s2410_s25 = smov 8  }
  0xf9   : > { %v2836_v11 = vld [vmem:[%s2828_s14] sm:$0xff]  ;;  %s3175_s17 = scalar_lea.vmem %s3174_s30, %s2781_s11  ;;  %s2411_s9 = smov 48  }
  0xfa   : > { %927 = vmatpush.msra.mxu0 %v900_v10  ;;  %v2023_v12 = vld [vmem:[%s3175_s17] ss:$0 sm:$0xff]  ;;  %s2412_s18 = smov 16   ;;  %s2413_s5 = smov 24  }
  0xfb   : > { %1820 = vmatmul.msk.f32.vlgmr.msra.gmra.mxu0 %vm908_vm2, %v2836_v11  ;;  %s3176_s28 = scalar_lea.vmem [#allocation7], %s2764_s15  ;;  %s3177_s30 = sld [smem:[#allocation47_spill]] }
 0x101   : > { %s3178_s17 = scalar_lea.vmem %s3177_s30, %s2781_s11 }
 0x178   : > { %v929_v13 = vpop.f32.mrf.mxu0 }
 0x179   : > { %v2845_v14 = vadd.f32 %v2023_v12, %v929_v13 }
 0x17b   : > { %987 = vrot.lane.b32.xlu2 %v2845_v14, %s2400_s19  ;;  %934 = vrot.lane.b32.xlu0 %v2845_v14, %s2401_s24  ;;  %v932_v15 = vmul.f32 0.35355338, %v2845_v14  ;;  %s3179_s19 = scalar_lea.vmem [#allocation8], %s2764_s15 }
 0x17d   : > { %1013 = vrot.lane.b32.xlu1 %v932_v15, %s2402_s12 }
 0x183   : > { %1067 = vrot.lane.b32.xlu2 %v2845_v14, %s2403_s10  ;;  %1015 = vrot.lane.b32.xlu0 %v2845_v14, %s2404_s27 }
 0x1d5   : > { %v988_v16 = vpop.permute.xlu2 %987 }
 0x1d6   : > { %1008 = vmatpush.msra.mxu2 %v988_v16 }
 0x1dd   : > { %v1068_v17 = vpop.permute.xlu2 %1067 }
 0x1de   : > { %1088 = vmatpush.msrb.mxu2 %v1068_v17 }
 0x1ed   : > { %v935_v18 = vpop.permute.xlu0 %934 }
 0x1ee   : > { %1821 = vmatpush.xpose.msk.msra.mxu1 %vm936_vm3, %v935_v18 }
 0x1ef   : > { %v1014_v20 = vpop.permute.xlu1 %1013 }
 0x1f1   : > { %1822 = vmatmul.msk.f32.vlgmr.msra.gmra.mxu1 %vm936_vm3, %v932_v15 }
 0x1f5   : > { %v1016_v19 = vpop.permute.xlu0 %1015 }
 0x1f6   : > { %1824 = vmatpush.xpose.msk.msra.mxu3 %vm936_vm3, %v1016_v19 }
 0x1f9   : > { %1825 = vmatmul.msk.f32.vlgmr.msra.gmra.mxu3 %vm936_vm3, %v1014_v20 }
 0x26e   : > { %v959_v21 = vpop.f32.mrf.mxu1 }
 0x26f   : > { %v960_v22 = vadd.f32 %v959_v21, %v2823_v5 }
 0x271   : > { %v962_v23 = vsel %vm936_vm3, %v960_v22, -inf }
 0x272   : > { %963 = vmax.xlane.f32.xlu1 %v962_v23 }
 0x27c   : > { %v1038_v24 = vpop.f32.mrf.mxu3 }
 0x27d   : > { %v1039_v25 = vadd.f32 %v1038_v24, %v2823_v5 }
 0x27f   : > { %v1041_v26 = vsel %vm936_vm3, %v1039_v25, -inf }
 0x280   : > { %1042 = vmax.xlane.f32.xlu2 %v1041_v26 }
 0x28b   : > { %1173 = vrot.lane.b32.xlu1 %v932_v15, %s2405_s1 }
 0x298   : > { %1175 = vrot.lane.b32.xlu2 %v2845_v14, %s2406_s4 }
 0x2e5   : > { %v964_v27 = vpop.xlane.xlu1 %963 }
 0x2e6   : > { %v965_v28 = vsub.f32 %v960_v22, %v964_v27 }
 0x2e8   : > { %v966_v29 = vmul.f32 1.442695, %v965_v28 }
 0x2ea   : > { %2031 = vpow2.f32 %v966_v29 }
 0x2f0   : > { %v2032_v30 = vpop.eup %2031 }
 0x2f1   : > { %v968_v31 = vsel %vm936_vm3, %v2032_v30, 0.0 }
 0x2f2   : > { %969 = vadd.xlane.f32.xlu2 %v968_v31 }
 0x2f3   : > { %v1043_v32 = vpop.xlane.xlu2 %1042 }
 0x2f4   : > { %v1044_v33 = vsub.f32 %v1039_v25, %v1043_v32 }
 0x2f6   : > { %v1045_v34 = vmul.f32 1.442695, %v1044_v33 }
 0x2f8   : > { %2033 = vpow2.f32 %v1045_v34 }
 0x2fb   : > { %v1176_v37 = vpop.permute.xlu2 %1175 }
 0x2fd   : > { %v1174_v0 = vpop.permute.xlu1 %1173 }
 0x2fe   : > { %v2034_v35 = vpop.eup %2033 }
 0x2ff   : > { %v1047_v36 = vsel %vm936_vm3, %v2034_v35, 0.0 }
 0x300   : > { %1048 = vadd.xlane.f32.xlu0 %v1047_v36 }
 0x30a   : > { %1095 = vrot.lane.b32.xlu2 %v2845_v14, %s2407_s8  ;;  %s3183_s8 = sld [smem:[#allocation27_spill]] }
 0x310   : > { %p1839_p0 = scmp.ne.s32.totalorder %s3183_s8, 1 }
 0x314   : > { %1093 = vrot.lane.b32.xlu0 %v932_v15, %s2408_s23 }
 0x365   : > { %v970_v38 = vpop.xlane.xlu2 %969 }
 0x366   : > { %2035 = vrcp.f32 %v970_v38  ;;  %v982_v43 = vand.u32 2147483648, %v970_v38  ;;  %v980_v45 = vand.u32 2147483647, %v970_v38  ;;  %vm976_vm5 = vweird.f32 %v970_v38 }
 0x368   : > { %v983_v48 = vor.u32 1.1754944e-38, %v982_v43  ;;  %vm981_vm7 = vcmp.eq.f32.partialorder %v980_v45, 8.507059e+37 }
 0x36c   : > { %v2036_v39 = vpop.eup %2035 }
 0x36d   : > { %v972_v40 = vmul.f32 %v2036_v39, %v970_v38  ;;  %v1096_v41 = vpop.permute.xlu2 %1095  ;;  %vm977_vm4 = vweird.f32 %v2036_v39 }
 0x36e   : > { %1828 = vmatpush.xpose.msk.msrb.mxu1 %vm936_vm3, %v1096_v41  ;;  %vm978_vm6 = vmor %vm976_vm5, %vm977_vm4 }
 0x36f   : > { %v973_v42 = vsub.f32 1.0, %v972_v40 }
 0x371   : > { %v974_v44 = vmul.f32 %v2036_v39, %v973_v42 }
 0x373   : > { %v1049_v46 = vpop.xlane.xlu0 %1048  ;;  %v975_v47 = vadd.f32 %v2036_v39, %v974_v44 }
 0x374   : > { %2037 = vrcp.f32 %v1049_v46  ;;  %v1061_v55 = vand.u32 2147483648, %v1049_v46  ;;  %v1059_v57 = vand.u32 2147483647, %v1049_v46  ;;  %vm1055_vm9 = vweird.f32 %v1049_v46 }
 0x375   : > { %v979_v49 = vsel %vm978_vm6, %v2036_v39, %v975_v47  ;;  %vm1266_vm6 = vcmask 130048  }
 0x376   : > { %v984_v50 = vsel %vm981_vm7, %v983_v48, %v979_v49  ;;  %v1062_v59 = vor.u32 1.1754944e-38, %v1061_v55  ;;  %vm1060_vm11 = vcmp.eq.f32.partialorder %v1059_v57, 8.507059e+37  ;;  %v1273_v48 = vld [vmem:[%s2794_s6 + $0x18] sm:$0xff]  ;;  %v1272_v49 = vld [vmem:[%s2794_s6 + $0x10] sm:$0xff]  ;;  %vm1268_vm7 = vcmask 195584  }
 0x377   : > { %v985_v51 = vmul.f32 %v2032_v30, %v984_v50  ;;  %1293 = vmatpush.msra.mxu1 %v1273_v48  ;;  %v1271_v50 = vld [vmem:[%s2794_s6 + $0x8] sm:$0xff] }
 0x379   : > { %986 = vst.msk [vmem:[%s2830_s20] sm:$0xff] %vm936_vm3, %v985_v51  ;;  %1823 = vmatmul.msk.f32.vlgmr.msra.gmra.mxu2 %vm936_vm3, %v985_v51  ;;  %1294 = vmatpush.msra.mxu1 %v1272_v49  ;;  %v1270_v51 = vld [vmem:[%s2794_s6] sm:$0xff] }
 0x37a   : > { %v2038_v52 = vpop.eup %2037  ;;  %1832 = vmatpush.xpose.msk.msra.mxu2 %vm936_vm3, %v1176_v37 }
 0x37b   : > { %v1051_v53 = vmul.f32 %v2038_v52, %v1049_v46  ;;  %vm1056_vm8 = vweird.f32 %v2038_v52  ;;  %1295 = vmatpush.msra.mxu1 %v1271_v50 }
 0x37c   : > { %vm1057_vm10 = vmor %vm1055_vm9, %vm1056_vm8 }
 0x37d   : > { %v1052_v54 = vsub.f32 1.0, %v1051_v53  ;;  %1296 = vmatpush.msra.mxu1 %v1270_v51 }
 0x37f   : > { %v1053_v56 = vmul.f32 %v2038_v52, %v1052_v54 }
 0x381   : > { %v1054_v58 = vadd.f32 %v2038_v52, %v1053_v56 }
 0x383   : > { %v1058_v60 = vsel %vm1057_vm10, %v2038_v52, %v1054_v58  ;;  %v2024_v58 = vld [vmem:[%s3176_s28] ss:$0 sm:$0xff] }
 0x384   : > { %v1063_v61 = vsel %vm1060_vm11, %v1062_v59, %v1058_v60  ;;  %vm1385_vm11 = vcmask 523264  }
 0x385   : > { %v1064_v62 = vmul.f32 %v2034_v35, %v1063_v61 }
 0x386   : > { %v1094_v63 = vpop.permute.xlu0 %1093 }
 0x387   : > { %1826 = vst.msk [vmem:[%s2830_s20 + $0x8] sm:$0xff] %vm936_vm3, %v1064_v62  ;;  %1827 = vmatmul.msk.f32.vlgmr.msrb.gmra.mxu2 %vm936_vm3, %v1064_v62  ;;  %1829 = vmatmul.msk.f32.vlgmr.msrb.gmra.mxu1 %vm936_vm3, %v1094_v63  ;;  %v2414_v63 = vmov 32.0  }
 0x38f   : > { %1833 = vmatmul.msk.f32.vlgmr.msra.gmra.mxu2 %vm936_vm3, %v1174_v0 }
 0x3fc   : > { %v2874_v1 = vpop.f32.mrf.mxu2 }
 0x404   : > { %v1118_v2 = vpop.f32.mrf.mxu1 }
 0x405   : > { %v1119_v3 = vadd.f32 %v1118_v2, %v2823_v5 }
 0x407   : > { %v1121_v4 = vsel %vm936_vm3, %v1119_v3, -inf }
 0x408   : > { %1122 = vmax.xlane.f32.xlu2 %v1121_v4 }
 0x40a   : > { %v1090_v6 = vpop.f32.mrf.mxu2 }
 0x412   : > { %v1198_v7 = vpop.f32.mrf.mxu2 }
 0x413   : > { %v1199_v8 = vadd.f32 %v1198_v7, %v2823_v5 }
 0x415   : > { %v1201_v9 = vsel %vm936_vm3, %v1199_v8, -inf }
 0x416   : > { %1202 = vmax.xlane.f32.xlu1 %v1201_v9 }
 0x42f   : > { %1227 = vrot.lane.b32.xlu1 %v2845_v14, %s2409_s0  ;;  %s3185_s0 = sld [smem:[#allocation56_spill]] (!%p1839_p0) }
 0x47b   : > { %v1123_v10 = vpop.xlane.xlu2 %1122 }
 0x47c   : > { %v1124_v12 = vsub.f32 %v1119_v3, %v1123_v10 }
 0x47e   : > { %v1125_v13 = vmul.f32 1.442695, %v1124_v12  ;;  %v1344_v12 = vld [vmem:[%s2803_s7 + $0x18] sm:$0xff] }
 0x480   : > { %2039 = vpow2.f32 %v1125_v13  ;;  %v1343_v13 = vld [vmem:[%s2803_s7 + $0x10] sm:$0xff] }
 0x486   : > { %v2040_v15 = vpop.eup %2039 }
 0x487   : > { %v1127_v16 = vsel %vm936_vm3, %v2040_v15, 0.0 }
 0x488   : > { %1128 = vadd.xlane.f32.xlu0 %v1127_v16  ;;  %v1341_v16 = vld [vmem:[%s2803_s7] sm:$0xff] }
 0x489   : > { %v1203_v17 = vpop.xlane.xlu1 %1202 }
 0x48a   : > { %v1204_v18 = vsub.f32 %v1199_v8, %v1203_v17  ;;  %v1380_v17 = vld [vmem:[%s2813_s16 + $0x38] sm:$0xff] }
 0x48b   : > { %1397 = vmatpush.msrb.mxu0 %v1380_v17 }
 0x48c   : > { %v1205_v19 = vmul.f32 1.442695, %v1204_v18  ;;  %v1379_v18 = vld [vmem:[%s2813_s16 + $0x30] sm:$0xff] }
 0x48d   : > { %1398 = vmatpush.msrb.mxu0 %v1379_v18 }
 0x48e   : > { %2041 = vpow2.f32 %v1205_v19  ;;  %v1378_v19 = vld [vmem:[%s2813_s16 + $0x28] sm:$0xff] }
 0x48f   : > { %1399 = vmatpush.msrb.mxu0 %v1378_v19 }
 0x494   : > { %v2042_v20 = vpop.eup %2041 }
 0x495   : > { %v1207_v5 = vsel %vm936_vm3, %v2042_v20, 0.0 }
 0x496   : > { %1208 = vadd.xlane.f32.xlu2 %v1207_v5 }
 0x49c   : > { %1254 = vrot.lane.b32.xlu0 %v1090_v6, %s2410_s25 }
 0x4a1   : > { %v1228_v21 = vpop.permute.xlu1 %1227 }
 0x4a2   : > { %1248 = vmatpush.msrb.mxu2 %v1228_v21  ;;  %v1377_v21 = vld [vmem:[%s2813_s16 + $0x20] sm:$0xff] }
 0x4a3   : > { %1400 = vmatpush.msrb.mxu0 %v1377_v21 }
 0x4ae   : > { %1147 = vrot.lane.b32.xlu2 %v2845_v14, %s2411_s9 }
 0x4fb   : > { %v1129_v22 = vpop.xlane.xlu0 %1128 }
 0x4fc   : > { %2043 = vrcp.f32 %v1129_v22  ;;  %v1141_v26 = vand.u32 2147483648, %v1129_v22  ;;  %v1139_v28 = vand.u32 2147483647, %v1129_v22  ;;  %vm1135_vm13 = vweird.f32 %v1129_v22 }
 0x4fe   : > { %v1142_v31 = vor.u32 1.1754944e-38, %v1141_v26  ;;  %vm1140_vm15 = vcmp.eq.f32.partialorder %v1139_v28, 8.507059e+37 }
 0x502   : > { %v2044_v23 = vpop.eup %2043 }
 0x503   : > { %v1131_v24 = vmul.f32 %v2044_v23, %v1129_v22  ;;  %vm1136_vm12 = vweird.f32 %v2044_v23 }
 0x504   : > { %vm1137_vm14 = vmor %vm1135_vm13, %vm1136_vm12 }
 0x505   : > { %v1132_v25 = vsub.f32 1.0, %v1131_v24 }
 0x507   : > { %v1133_v27 = vmul.f32 %v2044_v23, %v1132_v25 }
 0x509   : > { %v1134_v29 = vadd.f32 %v2044_v23, %v1133_v27  ;;  %v1209_v30 = vpop.xlane.xlu2 %1208 }
 0x50a   : > { %2045 = vrcp.f32 %v1209_v30  ;;  %v1221_v38 = vand.u32 2147483648, %v1209_v30  ;;  %v1219_v40 = vand.u32 2147483647, %v1209_v30  ;;  %vm1215_vm1 = vweird.f32 %v1209_v30 }
 0x50b   : > { %v1138_v32 = vsel %vm1137_vm14, %v2044_v23, %v1134_v29  ;;  %2047 = vrcp.f32 %v2414_v63  ;;  %v1376_v23 = vld [vmem:[%s2813_s16 + $0x18] sm:$0xff]  ;;  %v2030_v63 = vld [vmem:[%s734_s21] ss:$0 sm:$0xff] }
 0x50c   : > { %v1143_v33 = vsel %vm1140_vm15, %v1142_v31, %v1138_v32  ;;  %v1222_v42 = vor.u32 1.1754944e-38, %v1221_v38  ;;  %vm1220_vm5 = vcmp.eq.f32.partialorder %v1219_v40, 8.507059e+37  ;;  %1401 = vmatpush.msrb.mxu0 %v1376_v23  ;;  %v2027_v38 = vld [vmem:[%s865_s3] ss:$0 sm:$0xff] }
 0x50d   : > { %v1144_v14 = vmul.f32 %v2040_v15, %v1143_v33  ;;  %v1342_v15 = vld [vmem:[%s2803_s7 + $0x8] sm:$0xff]  ;;  %v2026_v33 = vld [vmem:[%s3179_s19] ss:$0 sm:$0xff] }
 0x50e   : > { %v1255_v52 = vpop.permute.xlu0 %1254 }
 0x50f   : > { %1830 = vst.msk [vmem:[%s2830_s20 + $0x10] sm:$0xff] %vm936_vm3, %v1144_v14  ;;  %v1265_v54 = vsel %vm936_vm3, %v2874_v1, %v1255_v52 }
 0x510   : > { %v2046_v34 = vpop.eup %2045 }
 0x511   : > { %v1211_v35 = vmul.f32 %v2046_v34, %v1209_v30  ;;  %v1148_v36 = vpop.permute.xlu2 %1147  ;;  %vm1216_vm0 = vweird.f32 %v2046_v34  ;;  %v2048_v0 = vpop.eup %2047  ;;  %v2025_v30 = vld [vmem:[%s3178_s17] ss:$0 sm:$0xff] }
 0x512   : > { %1168 = vmatpush.msrb.mxu3 %v1148_v36  ;;  %vm1217_vm4 = vmor %vm1215_vm1, %vm1216_vm0  ;;  %v1308_v1 = vmul.f32 32.0, %v2048_v0  ;;  %v1374_v36 = vld [vmem:[%s2813_s16 + $0x8] sm:$0xff] }
 0x513   : > { %v1212_v37 = vsub.f32 1.0, %v1211_v35  ;;  %1831 = vmatmul.msk.f32.vlgmr.msrb.gmra.mxu3 %vm936_vm3, %v1144_v14  ;;  %v1375_v35 = vld [vmem:[%s2813_s16 + $0x10] sm:$0xff] }
 0x514   : > { %v1309_v2 = vsub.f32 1.0, %v1308_v1  ;;  %1364 = vmatpush.msra.mxu3 %v1344_v12  ;;  %1402 = vmatpush.msrb.mxu0 %v1375_v35 }
 0x515   : > { %v1213_v39 = vmul.f32 %v2046_v34, %v1212_v37  ;;  %v1373_v37 = vld [vmem:[%s2813_s16] sm:$0xff] }
 0x516   : > { %v1310_v3 = vmul.f32 %v2048_v0, %v1309_v2  ;;  %1365 = vmatpush.msra.mxu3 %v1343_v13  ;;  %1403 = vmatpush.msrb.mxu0 %v1374_v36 }
 0x517   : > { %v1214_v41 = vadd.f32 %v2046_v34, %v1213_v39 }
 0x518   : > { %v1311_v4 = vadd.f32 %v2048_v0, %v1310_v3  ;;  %1366 = vmatpush.msra.mxu3 %v1342_v15  ;;  %1404 = vmatpush.msrb.mxu0 %v1373_v37 }
 0x519   : > { %v1218_v43 = vsel %vm1217_vm4, %v2046_v34, %v1214_v41 }
 0x51a   : > { %v1223_v44 = vsel %vm1220_vm5, %v1222_v42, %v1218_v43  ;;  %1367 = vmatpush.msra.mxu3 %v1341_v16  ;;  %v2028_v42 = vld [vmem:[%s873_s2] ss:$0 sm:$0xff] }
 0x51b   : > { %v1224_v45 = vmul.f32 %v2042_v20, %v1223_v44 }
 0x51d   : > { %1834 = vst.msk [vmem:[%s2830_s20 + $0x18] sm:$0xff] %vm936_vm3, %v1224_v45  ;;  %1835 = vmatmul.msk.f32.vlgmr.msrb.gmra.mxu2 %vm936_vm3, %v1224_v45  ;;  %vm1312_vm3 = vweird.f32 %v2048_v0 }
 0x51e   : > { %v2902_v6 = vsel %vm1312_vm3, %v2048_v0, %v1311_v4 }
 0x596   : > { %v1170_v46 = vpop.f32.mrf.mxu3 }
 0x597   : > { %1258 = vrot.lane.b32.xlu2 %v1170_v46, %s2412_s18 }
 0x5a0   : > { %v1250_v47 = vpop.f32.mrf.mxu2 }
 0x5a1   : > { %1262 = vrot.lane.b32.xlu0 %v1250_v47, %s2413_s5 }
 0x5f1   : > { %v1259_v53 = vpop.permute.xlu2 %1258 }
 0x5f2   : > { %v1267_v55 = vsel %vm1266_vm6, %v1265_v54, %v1259_v53 }
 0x613   : > { %v1263_v56 = vpop.permute.xlu0 %1262 }
 0x614   : > { %v1269_v57 = vsel %vm1268_vm7, %v1267_v55, %v1263_v56 }
 0x615   : > { %1836 = vmatmul.msk.f32.vlgmr.msra.gmra.mxu1 %vm908_vm2, %v1269_v57 }
 0x692   : > { %v1298_v59 = vpop.f32.mrf.mxu1 }
 0x693   : > { %v1299_v60 = vadd.f32 %v2024_v58, %v1298_v59 }
 0x695   : > { %v1301_v61 = vadd.f32 %v1299_v60, %v2836_v11 }
 0x697   : > { %v1304_v62 = vsel %vm908_vm2, %v1301_v61, 0.0 }
 0x698   : > { %1305 = vadd.xlane.f32.xlu1 %v1304_v62 }
 0x70b   : > { %v1306_v11 = vpop.xlane.xlu1 %1305 }
 0x70c   : > { %v1314_v7 = vmul.f32 %v2902_v6, %v1306_v11 }
 0x70e   : > { %v1315_v8 = vsub.f32 %v1301_v61, %v1314_v7  ;;  %v2029_v61 = vld [vmem:[%s876_s13] ss:$0 sm:$0xff]  ;;  %s3184_s13 = sld [smem:[#allocation55_spill]] (!%p1839_p0) }
 0x710   : > { %v1316_v9 = vmul.f32 %v1315_v8, %v1315_v8 }
 0x712   : > { %v1317_v10 = vsel %vm908_vm2, %v1316_v9, 0.0 }
 0x713   : > { %1318 = vadd.xlane.f32.xlu2 %v1317_v10 }
 0x786   : > { %v1319_v20 = vpop.xlane.xlu2 %1318 }
 0x787   : > { %v1320_v5 = vmul.f32 %v1319_v20, %v2902_v6 }
 0x789   : > { %v1321_v22 = vadd.f32 1e-05, %v1320_v5 }
 0x78b   : > { %2049 = vrsqrt.f32 %v1321_v22  ;;  %vm1328_vm9 = vweird.f32 %v1321_v22 }
 0x791   : > { %v2050_v24 = vpop.eup %2049 }
 0x792   : > { %v1323_v25 = vmul.f32 %v2050_v24, %v1321_v22  ;;  %vm1329_vm8 = vweird.f32 %v2050_v24 }
 0x793   : > { %vm1330_vm10 = vmor %vm1328_vm9, %vm1329_vm8 }
 0x794   : > { %v1324_v26 = vmul.f32 %v2050_v24, %v1323_v25 }
 0x796   : > { %v1325_v27 = vmul.f32 0.5, %v1324_v26 }
 0x798   : > { %v1326_v28 = vsub.f32 1.5, %v1325_v27 }
 0x79a   : > { %v1327_v29 = vmul.f32 %v2050_v24, %v1326_v28 }
 0x79c   : > { %v1331_v31 = vsel %vm1330_vm10, %v2050_v24, %v1327_v29 }
 0x79d   : > { %v1332_v32 = vmul.f32 %v1331_v31, %v1315_v8 }
 0x79f   : > { %v1336_v14 = vmul.f32 %v2025_v30, %v1332_v32 }
 0x7a1   : > { %v1340_v34 = vadd.f32 %v2026_v33, %v1336_v14 }
 0x7a3   : > { %1837 = vmatmul.msk.f32.vlgmr.msra.gmra.mxu3 %vm908_vm2, %v1340_v34 }
 0x826   : > { %v1369_v39 = vpop.f32.mrf.mxu3 }
 0x827   : > { %v1370_v40 = vadd.f32 %v2027_v38, %v1369_v39 }
 0x829   : > { %v1372_v41 = vmax.f32 %v1370_v40, 0.0 }
 0x82b   : > { %1838 = vmatmul.msk.f32.vlgmr.msrb.gmra.mxu0 %vm1385_vm11, %v1372_v41 }
 0x8a8   : > { %v1406_v43 = vpop.f32.mrf.mxu0 }
 0x8a9   : > { %v1407_v44 = vadd.f32 %v2028_v42, %v1406_v43 }
 0x8ab   : > { %v1409_v45 = vadd.f32 %v1407_v44, %v1340_v34 }
 0x8ad   : > { %v1412_v46 = vsel %vm908_vm2, %v1409_v45, 0.0 }
 0x8ae   : > { %1413 = vadd.xlane.f32.xlu0 %v1412_v46 }
 0x921   : > { %v1414_v47 = vpop.xlane.xlu0 %1413 }
 0x922   : > { %v1415_v48 = vmul.f32 %v1414_v47, %v2902_v6 }
 0x924   : > { %v1416_v49 = vsub.f32 %v1409_v45, %v1415_v48 }
 0x926   : > { %v1417_v50 = vmul.f32 %v1416_v49, %v1416_v49 }
 0x928   : > { %v1418_v51 = vsel %vm908_vm2, %v1417_v50, 0.0 }
 0x929   : > { %1419 = vadd.xlane.f32.xlu1 %v1418_v51 }
 0x99c   : > { %v1420_v52 = vpop.xlane.xlu1 %1419 }
 0x99d   : > { %v1421_v53 = vmul.f32 %v1420_v52, %v2902_v6 }
 0x99f   : > { %v1422_v54 = vadd.f32 1e-05, %v1421_v53 }
 0x9a1   : > { %2051 = vrsqrt.f32 %v1422_v54  ;;  %vm1429_vm13 = vweird.f32 %v1422_v54 }
 0x9a7   : > { %v2052_v55 = vpop.eup %2051 }
 0x9a8   : > { %v1424_v56 = vmul.f32 %v2052_v55, %v1422_v54  ;;  %vm1430_vm12 = vweird.f32 %v2052_v55 }
 0x9a9   : > { %vm1431_vm14 = vmor %vm1429_vm13, %vm1430_vm12 }
 0x9aa   : > { %v1425_v57 = vmul.f32 %v2052_v55, %v1424_v56 }
 0x9ac   : > { %v1426_v58 = vmul.f32 0.5, %v1425_v57 }
 0x9ae   : > { %v1427_v59 = vsub.f32 1.5, %v1426_v58 }
 0x9b0   : > { %v1428_v60 = vmul.f32 %v2052_v55, %v1427_v59 }
 0x9b2   : > { %v1432_v62 = vsel %vm1431_vm14, %v2052_v55, %v1428_v60 }
 0x9b3   : > { %v1433_v0 = vmul.f32 %v1432_v62, %v1416_v49 }
 0x9b5   : > { %v1437_v1 = vmul.f32 %v2029_v61, %v1433_v0  ;;  %1446 = sbr.rel (%p1839_p0) target bundleno = 2759 (0xac7), region = 112 }
 0x9b7   : > { %v1441_v2 = vadd.f32 %v2030_v63, %v1437_v1 }
 0x9b9   : > { %1442 = vst.msk [vmem:[%s2828_s14] sm:$0xff] %vm908_vm2, %v1441_v2 }
 0x9ba   : > { %v1449_v3 = vsel %vm908_vm2, %v1441_v2, 0.0  ;;  %v2053_v5 = vld [vmem:[%s3184_s13] ss:$0 sm:$0xff] }
 0x9bb   : > { %1450 = vadd.xlane.f32.xlu0 %v1449_v3 }
 0xa2e   : > { %v1451_v4 = vpop.xlane.xlu0 %1450 }
 0xa2f   : > { %v1452_v11 = vmul.f32 %v1451_v4, %v2902_v6 }
 0xa31   : > { %v1453_v7 = vsub.f32 %v1441_v2, %v1452_v11 }
 0xa33   : > { %v1454_v8 = vmul.f32 %v1453_v7, %v1453_v7 }
 0xa35   : > { %v1455_v9 = vsel %vm908_vm2, %v1454_v8, 0.0 }
 0xa36   : > { %1456 = vadd.xlane.f32.xlu0 %v1455_v9 }
 0xaa9   : > { %v1457_v10 = vpop.xlane.xlu0 %1456 }
 0xaaa   : > { %v1458_v12 = vmul.f32 %v1457_v10, %v2902_v6  ;;  %v2054_v6 = vld [vmem:[%s3185_s0] ss:$0 sm:$0xff] }
 0xaac   : > { %v1459_v13 = vadd.f32 1e-05, %v1458_v12 }
 0xaae   : > { %2055 = vrsqrt.f32 %v1459_v13  ;;  %vm1466_vm0 = vweird.f32 %v1459_v13 }
 0xab4   : > { %v2056_v15 = vpop.eup %2055 }
 0xab5   : > { %v1461_v16 = vmul.f32 %v2056_v15, %v1459_v13  ;;  %vm1467_vm15 = vweird.f32 %v2056_v15 }
 0xab6   : > { %vm1468_vm1 = vmor %vm1466_vm0, %vm1467_vm15 }
 0xab7   : > { %v1462_v17 = vmul.f32 %v2056_v15, %v1461_v16 }
 0xab9   : > { %v1463_v18 = vmul.f32 0.5, %v1462_v17 }
 0xabb   : > { %v1464_v19 = vsub.f32 1.5, %v1463_v18 }
 0xabd   : > { %v1465_v20 = vmul.f32 %v2056_v15, %v1464_v19 }
 0xabf   : > { %v1469_v21 = vsel %vm1468_vm1, %v2056_v15, %v1465_v20 }
 0xac0   : > { %v1470_v22 = vmul.f32 %v1469_v21, %v1453_v7 }
 0xac2   : > { %v1474_v23 = vmul.f32 %v2053_v5, %v1470_v22 }
 0xac4   : > { %v1478_v24 = vadd.f32 %v2054_v6, %v1474_v23 }
 0xac6   : > { %1479 = vst.msk [vmem:[%s2828_s14] sm:$0xff] %vm908_vm2, %v1478_v24 }
 0xac7 PF: > { %s3186_s9 = sld [smem:[#allocation28_spill]]  ;;  %s1498_s17 = sshll.u32 %s2828_s14, 4  ;;  %s1499_s17 = int_to_ptr.vmem [resolvable:$true] %s1498_s17 }
 0xac8   : > { %s3188_s7 = sld [smem:[#allocation57_spill]]  ;;  %s1481_s24 = scalar_lea.sflag [#allocation4], %s2745_s29 }
 0xacd   : > { %s1842_s5 = sshll.u32 %s3186_s9, 3 }
 0xace   : > { %s1496_s30 = scalar_lea.hbm %s3188_s7, %s1842_s5  ;;  %s2227_s4 = scalar_lea.hbm %s3188_s7, 16 }
 0xacf   : > { %s1500_s19 = sshll.u32 %s1496_s30, 4  ;;  %s1501_s19 = int_to_ptr.hbm [resolvable:$true] %s1500_s19 }
 0xad0   : > { %s2221_s12 = sshra.s32 %s1501_s19, 4  ;;  %s2222_s12 = int_to_ptr.hbm [resolvable:$true] %s2221_s12 }
 0xad1   : > { %s2223_s10 = scalar_lea.hbm %s2222_s12, 8  ;;  %p2228_p2 = scmp.lt.s32.totalorder %s2222_s12, %s3188_s7 }
 0xad2   : > { %p2224_p5 = scmp.ne.s32.totalorder %s2222_s12, %s2223_s10  ;;  %p2229_p4 = scmp.lt.s32.totalorder %s2227_s4, %s2223_s10 }
 0xad4   : > { %p2225_p10 = pnand %p2224_p5, %p2601_p8  ;;  %p2230_p1 = por %p2229_p4, %p2228_p2 }
 0xad6   : > { %p2226_p11 = pneg %p2225_p10 }
 0xad8   : > { %p2231_p3 = pnand %p2230_p1, %p2226_p11 }
 0xada   : > { %2234 = shalt.err (!%p2231_p3)
}
 0xadb   : > { %s3189_s29 = sld [smem:[#allocation27_spill]]  ;;  %s1514_s15 = sshll.u32 %s2830_s20, 4  ;;  %s1515_s15 = int_to_ptr.vmem [resolvable:$true] %s1514_s15 }
 0xadc   : > { %s3190_s14 = sld [smem:[#allocation21_spill]] }
 0xadd   : > { %1863 = dma.vmem_to_hbm [thread:$0]  (%p2601_p8), %s1499_s17, 128, %s1501_s19, %s1481_s24  }
 0xade   : > { %s3192_s0 = sld [smem:[#allocation58_spill]] }
 0xae1   : > { %s1843_s8 = sshll.u32 %s3189_s29, 1 }
 0xae2   : > { %s1508_s11 = sadd.s32 %s3186_s9, %s1843_s8  ;;  %s3194_s30 = sand.u32 1, %s3190_s14  }
 0xae3   : > { %s1852_s13 = sshll.u32 %s1508_s11, 5  ;;  %s1486_s12 = scalar_lea.sflag [#allocation13], %s3194_s30 }
 0xae4   : > { %s3193_s5 = smov %s3192_s0  ;;  %s1513_s28 = scalar_lea.hbm %s3192_s0, %s1852_s13 }
 0xae5   : > { %s1516_s6 = sshll.u32 %s1513_s28, 4  ;;  %s2255_s9 = scalar_lea.hbm %s3193_s5, 128  ;;  %s1517_s6 = int_to_ptr.hbm [resolvable:$true] %s1516_s6 }
 0xae6   : > { %s2249_s18 = sshra.s32 %s1517_s6, 4  ;;  %s2250_s18 = int_to_ptr.hbm [resolvable:$true] %s2249_s18 }
 0xae7   : > { %s2251_s10 = scalar_lea.hbm %s2250_s18, 32  ;;  %p2256_p6 = scmp.lt.s32.totalorder %s2250_s18, %s3193_s5 }
 0xae8   : > { %p2252_p7 = scmp.ne.s32.totalorder %s2250_s18, %s2251_s10  ;;  %p2257_p9 = scmp.lt.s32.totalorder %s2255_s9, %s2251_s10 }
 0xaea   : > { %p2253_p13 = pnand %p2252_p7, %p2614_p12  ;;  %p2258_p0 = por %p2257_p9, %p2256_p6 }
 0xaec   : > { %p2254_p8 = pneg %p2253_p13 }
 0xaee   : > { %p2259_p5 = pnand %p2258_p0, %p2254_p8 }
 0xaf0   : > { %2262 = shalt.err (!%p2259_p5)
}
 0xaf1   : > { %s2415_s27 = smov 128  }
 0xaf2   : > { %1864 = dma.vmem_to_hbm [thread:$0]  (%p2614_p12), %s1515_s15, 512, %s1517_s6, %s1486_s12, %s2415_s27, %s2415_s27, %s2410_s25  }
 0xaf3 PF: > { %s3195_s1 = sld [smem:[#allocation24_spill]]  ;;  %p1891_p10 = scmp.ge.s32.totalorder %s2397_s22, 2 }
 0xaf4   : > { %s3196_s4 = sld [smem:[#allocation32_spill]] }
 0xaf9   : > { %s1531_s3 = sand.u32 1, %s3195_s1  }
 0xafa   : > { %p3197_p11 = scmp.ne.s32.totalorder %s3196_s4, 0  ;;  %s1532_s16 = scalar_lea.sflag [#allocation4], %s1531_s3 }
 0xafc   : > { %p1884_p2 = pnand %p1891_p10, %p3197_p11 }
 0xafe   : > { %p1885_p4 = pneg %p1884_p2 }
 0xb00   : > { %2336 = dma.done.wait (%p1885_p4), %s1532_s16, 128  }
 0xb01   : > { %2338 = vsyncadd (%p1885_p4), %s1532_s16, 4294967168  ;;  %s3198_s29 = sld [smem:[#allocation20_spill]] }
 0xb02   : > { %s3199_s14 = sld [smem:[#allocation34_spill]] }
 0xb07   : > { %s1541_s8 = sand.u32 1, %s3198_s29  }
 0xb08   : > { %p3200_p1 = scmp.ne.s32.totalorder %s3199_s14, 0  ;;  %s1542_s2 = scalar_lea.sflag [#allocation13], %s1541_s8 }
 0xb0a   : > { %p1887_p3 = pnand %p1891_p10, %p3200_p1 }
 0xb0c   : > { %p1888_p7 = pneg %p1887_p3 }
 0xb0e   : > { %2340 = dma.done.wait (%p1888_p7), %s1542_s2, 512  }
 0xb0f   : > { %2342 = vsyncadd (%p1888_p7), %s1542_s2, 4294966784  ;;  %s43_s22 = sadd.s32 1, %s2397_s22   ;;  %s3202_s24 = sld [smem:[#allocation21_spill]] }
 0xb10   : > { %p3006_p12 = scmp.ge.s32.totalorder %s43_s22, 6   ;;  %s3203_s15 = sld [smem:[#allocation40_spill]] }
 0xb11   : > { %s3204_s27 = sld [smem:[#allocation22_spill]]  ;;  %s3215_s25 = smov %s2353_s26 }
 0xb12   : > { %s3205_s28 = sld [smem:[#allocation23_spill]] }
 0xb13   : > { %s3206_s29 = sld [smem:[#allocation38_spill]] }
 0xb14   : > { %s3207_s0 = sld [smem:[#allocation25_spill]] }
 0xb15   : > { %s3208_s30 = sld [smem:[#allocation26_spill]] }
 0xb16   : > { %s3209_s18 = sld [smem:[#allocation39_spill]]  ;;  %s3216_s26 = smov %s3203_s15 }
 0xb17   : > { %s3210_s19 = sld [smem:[#allocation29_spill]]  ;;  %42 = sbr.rel (!%p3006_p12) target bundleno = 35 (0x23), region = 232 }
 0xb18   : > { %s3211_s1 = sld [smem:[#allocation30_spill]] }
 0xb19   : > { %s3212_s20 = sld [smem:[#allocation35_spill]] }
 0xb1a   : > { %s3213_s21 = sld [smem:[#allocation37_spill]] }
 0xb1c   :  { %1548 = vsyncpa [#allocation3], 1 }
 0xb1d   :  { %1550 = vsyncpa [#allocation3 + $0x1], 1 }
 0xb1e   :  { %1551 = vsyncpa [#allocation6], 1 }
 0xb1f   :  { %1553 = vsyncpa [#allocation6 + $0x1], 1 }
 0xb20   :  { %1554 = vsyncpa [#allocation9], 1 }
 0xb21   :  { %1556 = vsyncpa [#allocation9 + $0x1], 1 }
 0xb22   :  { %1557 = vsyncpa [#allocation4], 1 }
 0xb23   :  { %1559 = vsyncpa [#allocation4 + $0x1], 1 }
 0xb24   :  { %1560 = vsyncpa [#allocation13], 1 }
 0xb25   :  { %1562 = vsyncpa [#allocation13 + $0x1], 1 }

</bundles_post_ra>
